<compile_context>
chip_gen: v5e
topology: v5e:2x2
jax: 0.10.0
libtpu: 0.0.40
codegen_flags: <defaults>
</compile_context>

<pallas_src>
import jax
import jax.numpy as jnp
from jax.experimental import pallas as pl
from jax.experimental.pallas import tpu as pltpu


PREDNET_LEN1 = 512
PREDNET_LEN2 = 256
Y_PAD = 128  # lane-dense padding of the final 1-wide output


def _round_up(x, m):
    return ((x + m - 1) // m) * m


def ncdm_kernel(u_ref, v_ref, vknow_ref,
                wt_ref, bt_ref, wkde_ref, bkde_ref,
                w1_ref, b1_ref, w2_ref, b2_ref, w3_ref, b3_ref,
                y_ref, theta_ref, disc_ref, diff_ref):
    know = theta_ref.shape[-1]

    # MXU operands in bf16; accumulation and all elementwise math in f32.
    u = u_ref[...].astype(jnp.bfloat16)
    v = v_ref[...].astype(jnp.bfloat16)

    theta = jax.nn.sigmoid(
        jnp.dot(u, wt_ref[...], preferred_element_type=jnp.float32) + bt_ref[...])

    # Fused kd|ed diagnostic layers: one (trait, 2*know) matmul, slice after.
    kde = jnp.dot(v, wkde_ref[...], preferred_element_type=jnp.float32) + bkde_ref[...]
    diff = jax.nn.sigmoid(kde[:, :know])
    disc = jax.nn.sigmoid(kde[:, know:])

    x = disc * (theta - diff) * vknow_ref[...]

    # int_fc: PosLinear(|W|) -> sigmoid; Dropout(p=0.5) is identity in eval mode.
    # |W| is precomputed in the wrapper (loop-invariant across grid steps).
    h1 = jax.nn.sigmoid(
        jnp.dot(x.astype(jnp.bfloat16), w1_ref[...],
                preferred_element_type=jnp.float32) + b1_ref[...])
    h2 = jax.nn.sigmoid(
        jnp.dot(h1.astype(jnp.bfloat16), w2_ref[...],
                preferred_element_type=jnp.float32) + b2_ref[...])
    y = jax.nn.sigmoid(
        jnp.dot(h2.astype(jnp.bfloat16), w3_ref[...],
                preferred_element_type=jnp.float32) + b3_ref[...])

    y_ref[...] = y            # lane-dense (TILE_B, 128); column 0 is the model output
    theta_ref[...] = theta
    disc_ref[...] = disc
    diff_ref[...] = diff


def make_params(key, trait_dim, know_dim, len1=PREDNET_LEN1, len2=PREDNET_LEN2):
    """PyTorch-like uniform(-1/sqrt(fan_in), 1/sqrt(fan_in)) init.

    Weights are returned already transposed to (in, out); biases as (1, out)."""
    def lin(k, fan_in, fan_out):
        kw, kb = jax.random.split(k)
        bound = 1.0 / jnp.sqrt(float(fan_in))
        w = jax.random.uniform(kw, (fan_in, fan_out), jnp.float32, -bound, bound)
        b = jax.random.uniform(kb, (1, fan_out), jnp.float32, -bound, bound)
        return w, b

    ks = jax.random.split(key, 6)
    wt, bt = lin(ks[0], trait_dim, know_dim)      # l_dtn_theta_fc
    wkd, bkd = lin(ks[1], trait_dim, know_dim)    # i_dtn_kd_fc
    wed, bed = lin(ks[2], trait_dim, know_dim)    # i_dtn_ed_fc
    w1, b1 = lin(ks[3], know_dim, len1)           # int_fc[0]
    w2, b2 = lin(ks[4], len1, len2)               # int_fc[3]
    w3, b3 = lin(ks[5], len2, 1)                  # int_fc[6]
    return (wt, bt, wkd, bkd, wed, bed, w1, b1, w2, b2, w3, b3)


def prepare_kernel_params(params):
    """One-time, out-of-kernel weight transforms: |W| for PosLinear, kd|ed fusion,
    lane-dense padding of the 1-wide output layer, bf16 cast of MXU weights."""
    wt, bt, wkd, bkd, wed, bed, w1, b1, w2, b2, w3, b3 = params
    bf = jnp.bfloat16
    wkde = jnp.concatenate([wkd, wed], axis=1).astype(bf)      # (trait, 2*know)
    bkde = jnp.concatenate([bkd, bed], axis=1)                 # (1, 2*know), f32
    len2 = w3.shape[0]
    w3p = jnp.zeros((len2, Y_PAD), bf).at[:, :1].set(jnp.abs(w3).astype(bf))
    b3p = jnp.zeros((1, Y_PAD), jnp.float32).at[:, :1].set(b3)
    return (wt.astype(bf), bt,
            wkde, bkde,
            jnp.abs(w1).astype(bf), b1,
            jnp.abs(w2).astype(bf), b2,
            w3p, b3p)


def ncdm_forward(u_trait, v_trait, v_know, kparams, tile_b=256):
    wt, bt, wkde, bkde, w1a, b1, w2a, b2, w3p, b3p = kparams
    trait_dim, know_dim = wt.shape
    len1 = w1a.shape[1]
    len2 = w2a.shape[1]

    B = u_trait.shape[0]
    tile_b = max(8, min(tile_b, _round_up(B, 8)))
    grid_b = pl.cdiv(B, tile_b)
    Bp = grid_b * tile_b
    if Bp != B:
        pad = ((0, Bp - B), (0, 0))
        u_trait = jnp.pad(u_trait, pad)
        v_trait = jnp.pad(v_trait, pad)
        v_know = jnp.pad(v_know, pad)

    row = lambda i: (i, 0)       # activation tiles walk the batch
    const = lambda i: (0, 0)     # weights/biases stay VMEM-resident (no re-DMA)

    in_specs = [
        pl.BlockSpec((tile_b, trait_dim), row),
        pl.BlockSpec((tile_b, trait_dim), row),
        pl.BlockSpec((tile_b, know_dim), row),
        pl.BlockSpec((trait_dim, know_dim), const),
        pl.BlockSpec((1, know_dim), const),
        pl.BlockSpec((trait_dim, 2 * know_dim), const),
        pl.BlockSpec((1, 2 * know_dim), const),
        pl.BlockSpec((know_dim, len1), const),
        pl.BlockSpec((1, len1), const),
        pl.BlockSpec((len1, len2), const),
        pl.BlockSpec((1, len2), const),
        pl.BlockSpec((len2, Y_PAD), const),
        pl.BlockSpec((1, Y_PAD), const),
    ]
    out_specs = (
        pl.BlockSpec((tile_b, Y_PAD), row),
        pl.BlockSpec((tile_b, know_dim), row),
        pl.BlockSpec((tile_b, know_dim), row),
        pl.BlockSpec((tile_b, know_dim), row),
    )
    out_shapes = (
        jax.ShapeDtypeStruct((Bp, Y_PAD), jnp.float32),
        jax.ShapeDtypeStruct((Bp, know_dim), jnp.float32),
        jax.ShapeDtypeStruct((Bp, know_dim), jnp.float32),
        jax.ShapeDtypeStruct((Bp, know_dim), jnp.float32),
    )

    flops = 2 * Bp * (trait_dim * know_dim + trait_dim * 2 * know_dim
                      + know_dim * len1 + len1 * len2 + len2 * Y_PAD)
    transcendentals = Bp * (3 * know_dim + len1 + len2 + Y_PAD)
    weight_bytes = sum(int(a.size) * a.dtype.itemsize for a in kparams)
    act_bytes = 4 * Bp * (2 * trait_dim + know_dim) + 4 * Bp * (Y_PAD + 3 * know_dim)
    cost = pl.CostEstimate(flops=flops, transcendentals=transcendentals,
                           bytes_accessed=weight_bytes + act_bytes)

    y_pad, theta, disc, diff = pl.pallas_call(
        ncdm_kernel,
        grid=(grid_b,),
        in_specs=in_specs,
        out_specs=out_specs,
        out_shape=out_shapes,
        compiler_params=pltpu.CompilerParams(
            dimension_semantics=("parallel",),
            vmem_limit_bytes=32 * 1024 * 1024,
        ),
        cost_estimate=cost,
    )(u_trait, v_trait, v_know, wt, bt, wkde, bkde, w1a, b1, w2a, b2, w3p, b3p)

    # Drop batch padding and the lane padding of the final layer.
    return y_pad[:B, 0], theta[:B], disc[:B], diff[:B]


def ncdm_reference(u, v, vk, params):
    """Pure-JAX f32 reference (PyTorch eval-mode semantics)."""
    wt, bt, wkd, bkd, wed, bed, w1, b1, w2, b2, w3, b3 = params
    theta = jax.nn.sigmoid(u @ wt + bt)
    diff = jax.nn.sigmoid(v @ wkd + bkd)
    disc = jax.nn.sigmoid(v @ wed + bed)
    x = disc * (theta - diff) * vk
    h1 = jax.nn.sigmoid(x @ jnp.abs(w1) + b1)
    h2 = jax.nn.sigmoid(h1 @ jnp.abs(w2) + b2)
    y = jax.nn.sigmoid(h2 @ jnp.abs(w3) + b3)
    return y.reshape(-1), theta, disc, diff


if __name__ == "__main__":
    B = 8
    trait_dim = 32
    know_dim = 128

    key = jax.random.PRNGKey(0)
    k_u, k_v, k_k, k_p = jax.random.split(key, 4)

    u_trait = jax.random.normal(k_u, (B, trait_dim), jnp.float32)
    v_trait = jax.random.normal(k_v, (B, trait_dim), jnp.float32)
    v_know = jax.random.bernoulli(k_k, 0.3, (B, know_dim)).astype(jnp.float32)

    params = make_params(k_p, trait_dim, know_dim)
    kparams = prepare_kernel_params(params)

    y, theta, disc, diff = ncdm_forward(u_trait, v_trait, v_know, kparams)
    jax.block_until_ready((y, theta, disc, diff))

    assert y.shape == (B,)
    assert theta.shape == (B, know_dim)
    assert disc.shape == (B, know_dim)
    assert diff.shape == (B, know_dim)

    y_r, th_r, di_r, df_r = ncdm_reference(u_trait, v_trait, v_know, params)
    assert float(jnp.max(jnp.abs(theta - th_r))) < 1e-2
    assert float(jnp.max(jnp.abs(disc - di_r))) < 1e-2
    assert float(jnp.max(jnp.abs(diff - df_r))) < 1e-2
    assert float(jnp.max(jnp.abs(y - y_r))) < 2e-2

    print("KERNEL_OK")
</pallas_src>

<mosaic_0001>
module attributes {stable_mosaic.version = 11 : i64} {
  func.func @ncdm_kernel(%arg0: i32, %arg1: memref<8x32xf32, #tpu.memory_space<vmem>>, %arg2: memref<8x32xf32, #tpu.memory_space<vmem>>, %arg3: memref<8x128xf32, #tpu.memory_space<vmem>>, %arg4: memref<32x128xbf16, #tpu.memory_space<vmem>>, %arg5: memref<1x128xf32, #tpu.memory_space<vmem>>, %arg6: memref<32x256xbf16, #tpu.memory_space<vmem>>, %arg7: memref<1x256xf32, #tpu.memory_space<vmem>>, %arg8: memref<128x512xbf16, #tpu.memory_space<vmem>>, %arg9: memref<1x512xf32, #tpu.memory_space<vmem>>, %arg10: memref<512x256xbf16, #tpu.memory_space<vmem>>, %arg11: memref<1x256xf32, #tpu.memory_space<vmem>>, %arg12: memref<256x128xbf16, #tpu.memory_space<vmem>>, %arg13: memref<1x128xf32, #tpu.memory_space<vmem>>, %arg14: memref<8x128xf32, #tpu.memory_space<vmem>>, %arg15: memref<8x128xf32, #tpu.memory_space<vmem>>, %arg16: memref<8x128xf32, #tpu.memory_space<vmem>>, %arg17: memref<8x128xf32, #tpu.memory_space<vmem>>) attributes {dimension_semantics = [#tpu.dimension_semantics<parallel>], iteration_bounds = array<i64: 1>, scalar_prefetch = 0 : i64, scratch_operands = 0 : i64, tpu.core_type = #tpu.core_type<tc>, window_params = [{transform_indices = @transform_0, window_bounds = array<i64: 8, 32>}, {transform_indices = @transform_1, window_bounds = array<i64: 8, 32>}, {transform_indices = @transform_2, window_bounds = array<i64: 8, 128>}, {pipeline_mode = #tpu.pipeline_mode<synchronous>, transform_indices = @transform_3, window_bounds = array<i64: 32, 128>}, {pipeline_mode = #tpu.pipeline_mode<synchronous>, transform_indices = @transform_4, window_bounds = array<i64: 1, 128>}, {pipeline_mode = #tpu.pipeline_mode<synchronous>, transform_indices = @transform_5, window_bounds = array<i64: 32, 256>}, {pipeline_mode = #tpu.pipeline_mode<synchronous>, transform_indices = @transform_6, window_bounds = array<i64: 1, 256>}, {pipeline_mode = #tpu.pipeline_mode<synchronous>, transform_indices = @transform_7, window_bounds = array<i64: 128, 512>}, {pipeline_mode = #tpu.pipeline_mode<synchronous>, transform_indices = @transform_8, window_bounds = array<i64: 1, 512>}, {pipeline_mode = #tpu.pipeline_mode<synchronous>, transform_indices = @transform_9, window_bounds = array<i64: 512, 256>}, {pipeline_mode = #tpu.pipeline_mode<synchronous>, transform_indices = @transform_10, window_bounds = array<i64: 1, 256>}, {pipeline_mode = #tpu.pipeline_mode<synchronous>, transform_indices = @transform_11, window_bounds = array<i64: 256, 128>}, {pipeline_mode = #tpu.pipeline_mode<synchronous>, transform_indices = @transform_12, window_bounds = array<i64: 1, 128>}, {transform_indices = @transform_13, window_bounds = array<i64: 8, 128>}, {transform_indices = @transform_14, window_bounds = array<i64: 8, 128>}, {transform_indices = @transform_15, window_bounds = array<i64: 8, 128>}, {transform_indices = @transform_16, window_bounds = array<i64: 8, 128>}]} {
    %c0 = arith.constant 0 : index
    %c0_0 = arith.constant 0 : index
    %0 = vector.load %arg1[%c0, %c0_0] : memref<8x32xf32, #tpu.memory_space<vmem>>, vector<8x32xf32>
    %1 = arith.truncf %0 : vector<8x32xf32> to vector<8x32xbf16>
    %c0_1 = arith.constant 0 : index
    %c0_2 = arith.constant 0 : index
    %2 = vector.load %arg2[%c0_1, %c0_2] : memref<8x32xf32, #tpu.memory_space<vmem>>, vector<8x32xf32>
    %3 = arith.truncf %2 : vector<8x32xf32> to vector<8x32xbf16>
    %c0_3 = arith.constant 0 : index
    %c0_4 = arith.constant 0 : index
    %4 = vector.load %arg4[%c0_3, %c0_4] : memref<32x128xbf16, #tpu.memory_space<vmem>>, vector<32x128xbf16>
    %cst = arith.constant dense<0.000000e+00> : vector<8x128xf32>
    %5 = tpu.matmul %1, %4, %cst {dimension_numbers = #tpu.dot_dimension_numbers<[1], [0], [0], [1], [0, 0, 1, 1], [], []>} : vector<8x32xbf16>, vector<32x128xbf16>, vector<8x128xf32> -> vector<8x128xf32>
    %c0_5 = arith.constant 0 : index
    %c0_6 = arith.constant 0 : index
    %6 = vector.load %arg5[%c0_5, %c0_6] : memref<1x128xf32, #tpu.memory_space<vmem>>, vector<1x128xf32>
    %7 = vector.broadcast %6 : vector<1x128xf32> to vector<8x128xf32>
    %8 = arith.addf %5, %7 : vector<8x128xf32>
    %9 = arith.negf %8 : vector<8x128xf32>
    %10 = math.exp %9 : vector<8x128xf32>
    %cst_7 = arith.constant 1.000000e+00 : f32
    %11 = vector.broadcast %cst_7 : f32 to vector<8x128xf32>
    %12 = arith.addf %11, %10 : vector<8x128xf32>
    %13 = arith.divf %11, %12 : vector<8x128xf32>
    %c0_8 = arith.constant 0 : index
    %c0_9 = arith.constant 0 : index
    %14 = vector.load %arg6[%c0_8, %c0_9] : memref<32x256xbf16, #tpu.memory_space<vmem>>, vector<32x256xbf16>
    %cst_10 = arith.constant dense<0.000000e+00> : vector<8x256xf32>
    %15 = tpu.matmul %3, %14, %cst_10 {dimension_numbers = #tpu.dot_dimension_numbers<[1], [0], [0], [1], [0, 0, 1, 1], [], []>} : vector<8x32xbf16>, vector<32x256xbf16>, vector<8x256xf32> -> vector<8x256xf32>
    %c0_11 = arith.constant 0 : index
    %c0_12 = arith.constant 0 : index
    %16 = vector.load %arg7[%c0_11, %c0_12] : memref<1x256xf32, #tpu.memory_space<vmem>>, vector<1x256xf32>
    %17 = vector.broadcast %16 : vector<1x256xf32> to vector<8x256xf32>
    %18 = arith.addf %15, %17 : vector<8x256xf32>
    %19 = vector.extract_strided_slice %18 {offsets = [0, 0], sizes = [8, 128], strides = [1, 1]} : vector<8x256xf32> to vector<8x128xf32>
    %20 = arith.negf %19 : vector<8x128xf32>
    %21 = math.exp %20 : vector<8x128xf32>
    %cst_13 = arith.constant 1.000000e+00 : f32
    %22 = vector.broadcast %cst_13 : f32 to vector<8x128xf32>
    %23 = arith.addf %22, %21 : vector<8x128xf32>
    %24 = arith.divf %22, %23 : vector<8x128xf32>
    %25 = vector.extract_strided_slice %18 {offsets = [0, 128], sizes = [8, 128], strides = [1, 1]} : vector<8x256xf32> to vector<8x128xf32>
    %26 = arith.negf %25 : vector<8x128xf32>
    %27 = math.exp %26 : vector<8x128xf32>
    %cst_14 = arith.constant 1.000000e+00 : f32
    %28 = vector.broadcast %cst_14 : f32 to vector<8x128xf32>
    %29 = arith.addf %28, %27 : vector<8x128xf32>
    %30 = arith.divf %28, %29 : vector<8x128xf32>
    %31 = arith.subf %13, %24 : vector<8x128xf32>
    %32 = arith.mulf %30, %31 : vector<8x128xf32>
    %c0_15 = arith.constant 0 : index
    %c0_16 = arith.constant 0 : index
    %33 = vector.load %arg3[%c0_15, %c0_16] : memref<8x128xf32, #tpu.memory_space<vmem>>, vector<8x128xf32>
    %34 = arith.mulf %32, %33 : vector<8x128xf32>
    %35 = arith.truncf %34 : vector<8x128xf32> to vector<8x128xbf16>
    %c0_17 = arith.constant 0 : index
    %c0_18 = arith.constant 0 : index
    %36 = vector.load %arg8[%c0_17, %c0_18] : memref<128x512xbf16, #tpu.memory_space<vmem>>, vector<128x512xbf16>
    %cst_19 = arith.constant dense<0.000000e+00> : vector<8x512xf32>
    %37 = tpu.matmul %35, %36, %cst_19 {dimension_numbers = #tpu.dot_dimension_numbers<[1], [0], [0], [1], [0, 0, 1, 1], [], []>} : vector<8x128xbf16>, vector<128x512xbf16>, vector<8x512xf32> -> vector<8x512xf32>
    %c0_20 = arith.constant 0 : index
    %c0_21 = arith.constant 0 : index
    %38 = vector.load %arg9[%c0_20, %c0_21] : memref<1x512xf32, #tpu.memory_space<vmem>>, vector<1x512xf32>
    %39 = vector.broadcast %38 : vector<1x512xf32> to vector<8x512xf32>
    %40 = arith.addf %37, %39 : vector<8x512xf32>
    %41 = arith.negf %40 : vector<8x512xf32>
    %42 = math.exp %41 : vector<8x512xf32>
    %cst_22 = arith.constant 1.000000e+00 : f32
    %43 = vector.broadcast %cst_22 : f32 to vector<8x512xf32>
    %44 = arith.addf %43, %42 : vector<8x512xf32>
    %45 = arith.divf %43, %44 : vector<8x512xf32>
    %46 = arith.truncf %45 : vector<8x512xf32> to vector<8x512xbf16>
    %c0_23 = arith.constant 0 : index
    %c0_24 = arith.constant 0 : index
    %47 = vector.load %arg10[%c0_23, %c0_24] : memref<512x256xbf16, #tpu.memory_space<vmem>>, vector<512x256xbf16>
    %cst_25 = arith.constant dense<0.000000e+00> : vector<8x256xf32>
    %48 = tpu.matmul %46, %47, %cst_25 {dimension_numbers = #tpu.dot_dimension_numbers<[1], [0], [0], [1], [0, 0, 1, 1], [], []>} : vector<8x512xbf16>, vector<512x256xbf16>, vector<8x256xf32> -> vector<8x256xf32>
    %c0_26 = arith.constant 0 : index
    %c0_27 = arith.constant 0 : index
    %49 = vector.load %arg11[%c0_26, %c0_27] : memref<1x256xf32, #tpu.memory_space<vmem>>, vector<1x256xf32>
    %50 = vector.broadcast %49 : vector<1x256xf32> to vector<8x256xf32>
    %51 = arith.addf %48, %50 : vector<8x256xf32>
    %52 = arith.negf %51 : vector<8x256xf32>
    %53 = math.exp %52 : vector<8x256xf32>
    %cst_28 = arith.constant 1.000000e+00 : f32
    %54 = vector.broadcast %cst_28 : f32 to vector<8x256xf32>
    %55 = arith.addf %54, %53 : vector<8x256xf32>
    %56 = arith.divf %54, %55 : vector<8x256xf32>
    %57 = arith.truncf %56 : vector<8x256xf32> to vector<8x256xbf16>
    %c0_29 = arith.constant 0 : index
    %c0_30 = arith.constant 0 : index
    %58 = vector.load %arg12[%c0_29, %c0_30] : memref<256x128xbf16, #tpu.memory_space<vmem>>, vector<256x128xbf16>
    %cst_31 = arith.constant dense<0.000000e+00> : vector<8x128xf32>
    %59 = tpu.matmul %57, %58, %cst_31 {dimension_numbers = #tpu.dot_dimension_numbers<[1], [0], [0], [1], [0, 0, 1, 1], [], []>} : vector<8x256xbf16>, vector<256x128xbf16>, vector<8x128xf32> -> vector<8x128xf32>
    %c0_32 = arith.constant 0 : index
    %c0_33 = arith.constant 0 : index
    %60 = vector.load %arg13[%c0_32, %c0_33] : memref<1x128xf32, #tpu.memory_space<vmem>>, vector<1x128xf32>
    %61 = vector.broadcast %60 : vector<1x128xf32> to vector<8x128xf32>
    %62 = arith.addf %59, %61 : vector<8x128xf32>
    %63 = arith.negf %62 : vector<8x128xf32>
    %64 = math.exp %63 : vector<8x128xf32>
    %cst_34 = arith.constant 1.000000e+00 : f32
    %65 = vector.broadcast %cst_34 : f32 to vector<8x128xf32>
    %66 = arith.addf %65, %64 : vector<8x128xf32>
    %67 = arith.divf %65, %66 : vector<8x128xf32>
    %c0_35 = arith.constant 0 : index
    %c0_36 = arith.constant 0 : index
    %68 = vector.load %arg14[%c0_35, %c0_36] : memref<8x128xf32, #tpu.memory_space<vmem>>, vector<8x128xf32>
    tpu.vector_store %arg14[%c0_35, %c0_36], %67 {strides = array<i32>} : memref<8x128xf32, #tpu.memory_space<vmem>>, vector<8x128xf32>,
    %c0_37 = arith.constant 0 : index
    %c0_38 = arith.constant 0 : index
    %69 = vector.load %arg15[%c0_37, %c0_38] : memref<8x128xf32, #tpu.memory_space<vmem>>, vector<8x128xf32>
    tpu.vector_store %arg15[%c0_37, %c0_38], %13 {strides = array<i32>} : memref<8x128xf32, #tpu.memory_space<vmem>>, vector<8x128xf32>,
    %c0_39 = arith.constant 0 : index
    %c0_40 = arith.constant 0 : index
    %70 = vector.load %arg16[%c0_39, %c0_40] : memref<8x128xf32, #tpu.memory_space<vmem>>, vector<8x128xf32>
    tpu.vector_store %arg16[%c0_39, %c0_40], %30 {strides = array<i32>} : memref<8x128xf32, #tpu.memory_space<vmem>>, vector<8x128xf32>,
    %c0_41 = arith.constant 0 : index
    %c0_42 = arith.constant 0 : index
    %71 = vector.load %arg17[%c0_41, %c0_42] : memref<8x128xf32, #tpu.memory_space<vmem>>, vector<8x128xf32>
    tpu.vector_store %arg17[%c0_41, %c0_42], %24 {strides = array<i32>} : memref<8x128xf32, #tpu.memory_space<vmem>>, vector<8x128xf32>,
    return
  }
  func.func @transform_0(%arg0: i32) -> (i32, i32) {
    %c0_i32 = arith.constant 0 : i32
    %c0_i32_0 = arith.constant 0 : i32
    return %arg0, %c0_i32 : i32, i32
  }
  func.func @transform_1(%arg0: i32) -> (i32, i32) {
    %c0_i32 = arith.constant 0 : i32
    %c0_i32_0 = arith.constant 0 : i32
    return %arg0, %c0_i32 : i32, i32
  }
  func.func @transform_2(%arg0: i32) -> (i32, i32) {
    %c0_i32 = arith.constant 0 : i32
    %c0_i32_0 = arith.constant 0 : i32
    return %arg0, %c0_i32 : i32, i32
  }
  func.func @transform_3(%arg0: i32) -> (i32, i32) {
    %c0_i32 = arith.constant 0 : i32
    %c0_i32_0 = arith.constant 0 : i32
    %c0_i32_1 = arith.constant 0 : i32
    return %c0_i32, %c0_i32_0 : i32, i32
  }
  func.func @transform_4(%arg0: i32) -> (i32, i32) {
    %c0_i32 = arith.constant 0 : i32
    %c0_i32_0 = arith.constant 0 : i32
    %c0_i32_1 = arith.constant 0 : i32
    return %c0_i32, %c0_i32_0 : i32, i32
  }
  func.func @transform_5(%arg0: i32) -> (i32, i32) {
    %c0_i32 = arith.constant 0 : i32
    %c0_i32_0 = arith.constant 0 : i32
    %c0_i32_1 = arith.constant 0 : i32
    return %c0_i32, %c0_i32_0 : i32, i32
  }
  func.func @transform_6(%arg0: i32) -> (i32, i32) {
    %c0_i32 = arith.constant 0 : i32
    %c0_i32_0 = arith.constant 0 : i32
    %c0_i32_1 = arith.constant 0 : i32
    return %c0_i32, %c0_i32_0 : i32, i32
  }
  func.func @transform_7(%arg0: i32) -> (i32, i32) {
    %c0_i32 = arith.constant 0 : i32
    %c0_i32_0 = arith.constant 0 : i32
    %c0_i32_1 = arith.constant 0 : i32
    return %c0_i32, %c0_i32_0 : i32, i32
  }
  func.func @transform_8(%arg0: i32) -> (i32, i32) {
    %c0_i32 = arith.constant 0 : i32
    %c0_i32_0 = arith.constant 0 : i32
    %c0_i32_1 = arith.constant 0 : i32
    return %c0_i32, %c0_i32_0 : i32, i32
  }
  func.func @transform_9(%arg0: i32) -> (i32, i32) {
    %c0_i32 = arith.constant 0 : i32
    %c0_i32_0 = arith.constant 0 : i32
    %c0_i32_1 = arith.constant 0 : i32
    return %c0_i32, %c0_i32_0 : i32, i32
  }
  func.func @transform_10(%arg0: i32) -> (i32, i32) {
    %c0_i32 = arith.constant 0 : i32
    %c0_i32_0 = arith.constant 0 : i32
    %c0_i32_1 = arith.constant 0 : i32
    return %c0_i32, %c0_i32_0 : i32, i32
  }
  func.func @transform_11(%arg0: i32) -> (i32, i32) {
    %c0_i32 = arith.constant 0 : i32
    %c0_i32_0 = arith.constant 0 : i32
    %c0_i32_1 = arith.constant 0 : i32
    return %c0_i32, %c0_i32_0 : i32, i32
  }
  func.func @transform_12(%arg0: i32) -> (i32, i32) {
    %c0_i32 = arith.constant 0 : i32
    %c0_i32_0 = arith.constant 0 : i32
    %c0_i32_1 = arith.constant 0 : i32
    return %c0_i32, %c0_i32_0 : i32, i32
  }
  func.func @transform_13(%arg0: i32) -> (i32, i32) {
    %c0_i32 = arith.constant 0 : i32
    %c0_i32_0 = arith.constant 0 : i32
    return %arg0, %c0_i32 : i32, i32
  }
  func.func @transform_14(%arg0: i32) -> (i32, i32) {
    %c0_i32 = arith.constant 0 : i32
    %c0_i32_0 = arith.constant 0 : i32
    return %arg0, %c0_i32 : i32, i32
  }
  func.func @transform_15(%arg0: i32) -> (i32, i32) {
    %c0_i32 = arith.constant 0 : i32
    %c0_i32_0 = arith.constant 0 : i32
    return %arg0, %c0_i32 : i32, i32
  }
  func.func @transform_16(%arg0: i32) -> (i32, i32) {
    %c0_i32 = arith.constant 0 : i32
    %c0_i32_0 = arith.constant 0 : i32
    return %arg0, %c0_i32 : i32, i32
  }
}

</mosaic_0001>

<bundles_post_ra>
// kernel: tpu_custom_call.1
= control target key start
LH: loop header
LB: loop body
LE: loop exit
PB: predicated region body
PF: predicated region fallthrough
CT: control target
= control target key end

     0   :  { %s2684_s0 = inlined_call_operand.hbm [shape: f32[8,32], index: 0, kind: input, shape index: {}]   ;;  %s2685_s1 = inlined_call_operand.hbm [shape: f32[8,32], index: 1, kind: input, shape index: {}]   ;;  %s2686_s2 = inlined_call_operand.hbm [shape: f32[8,128], index: 2, kind: input, shape index: {}]   ;;  %s2687_s3 = inlined_call_operand.hbm [shape: bf16[32,128], index: 3, kind: input, shape index: {}]   ;;  %s2688_s4 = inlined_call_operand.hbm [shape: f32[1,128], index: 4, kind: input, shape index: {}]   ;;  %s2689_s5 = inlined_call_operand.hbm [shape: bf16[32,256], index: 5, kind: input, shape index: {}]   ;;  %s2690_s6 = inlined_call_operand.vmem [shape: f32[1,256], index: 6, kind: input, shape index: {}]   ;;  %s2691_s7 = inlined_call_operand.hbm [shape: bf16[128,512], index: 7, kind: input, shape index: {}]   ;;  %s2692_s8 = inlined_call_operand.vmem [shape: f32[1,512], index: 8, kind: input, shape index: {}]   ;;  %s2693_s9 = inlined_call_operand.hbm [shape: bf16[512,256], index: 9, kind: input, shape index: {}]   ;;  %s2694_s10 = inlined_call_operand.vmem [shape: f32[1,256], index: 10, kind: input, shape index: {}]   ;;  %s2695_s11 = inlined_call_operand.hbm [shape: bf16[256,128], index: 11, kind: input, shape index: {}]   ;;  %s2696_s12 = inlined_call_operand.vmem [shape: f32[1,128], index: 12, kind: input, shape index: {}]   ;;  %s2697_s13 = inlined_call_operand.hbm [shape: f32[8,128], index: 13, kind: output, shape index: {0}]   ;;  %s2698_s14 = inlined_call_operand.hbm [shape: f32[8,128], index: 14, kind: output, shape index: {1}]   ;;  %s2699_s15 = inlined_call_operand.hbm [shape: f32[8,128], index: 15, kind: output, shape index: {2}]   ;;  %s2700_s16 = inlined_call_operand.hbm [shape: f32[8,128], index: 16, kind: output, shape index: {3}]  }
   0x1   :  { %2702 = sst [smem:[#allocation31_spill]] %s2684_s0 }
   0x2   :  { %22 = vsyncpa [#allocation3], 0 }
   0x3   :  { %23 = vsyncpa [#allocation6], 0 }
   0x4   :  { %24 = vsyncpa [#allocation9], 0 }
   0x5   :  { %25 = vsyncpa [#allocation12], 0 }
   0x6   :  { %26 = vsyncpa [#allocation15], 0 }
   0x7   :  { %27 = vsyncpa [#allocation4], 0 }
   0x8   :  { %28 = vsyncpa [#allocation19], 0  ;;  %s46_s23 = sshll.u32 %s2685_s1, 4  ;;  %s47_s23 = int_to_ptr.hbm [resolvable:$true] %s46_s23 }
   0x9   :  { %29 = vsyncpa [#allocation22], 0  ;;  %s2455_s24 = smov [#allocation5]   ;;  %s67_s28 = sshll.u32 %s2687_s3, 4  ;;  %s68_s28 = int_to_ptr.hbm [resolvable:$true] %s67_s28 }
   0xa   :  { %s48_s25 = sshll.u32 %s2455_s24, 4  ;;  %s2456_s29 = smov [#allocation8]   ;;  %s49_s25 = int_to_ptr.vmem [resolvable:$true] %s48_s25 }
   0xb   :  { %51 = dma.hbm_to_vmem [thread:$0]  %s47_s23, 128, %s49_s25, [#allocation6]  }
   0xc   :  { %s69_s30 = sshll.u32 %s2456_s29, 4  ;;  %s2701_s0 = smov 64   ;;  %s70_s30 = int_to_ptr.vmem [resolvable:$true] %s69_s30 }
   0xd   :  { %s2458_s17 = smov 4   ;;  %s91_s19 = sshll.u32 %s2689_s5, 4  ;;  %s92_s19 = int_to_ptr.hbm [resolvable:$true] %s91_s19 }
   0xe   :  { %75 = dma.hbm_to_vmem [thread:$0]  %s68_s28, 256, %s70_s30, [#allocation9], %s2701_s0, %s2701_s0, %s2458_s17  }
   0xf   :  { %s2459_s20 = smov [#allocation11]   ;;  %s121_s23 = sshll.u32 %s2693_s9, 4  ;;  %s122_s23 = int_to_ptr.hbm [resolvable:$true] %s121_s23 }
  0x10   :  { %s93_s21 = sshll.u32 %s2459_s20, 4  ;;  %s2460_s24 = smov 128   ;;  %s94_s21 = int_to_ptr.vmem [resolvable:$true] %s93_s21 }
  0x11   :  { %s2461_s25 = smov 8   ;;  %s2462_s26 = smov [#allocation14]  }
  0x12   :  { %99 = dma.hbm_to_vmem [thread:$0]  %s92_s19, 512, %s94_s21, [#allocation12], %s2460_s24, %s2460_s24, %s2461_s25  }
  0x13   :  { %s123_s27 = sshll.u32 %s2462_s26, 4  ;;  %s2703_s30 = sld [smem:[#allocation31_spill]]  ;;  %s124_s27 = int_to_ptr.vmem [resolvable:$true] %s123_s27 }
  0x14   :  { %129 = dma.hbm_to_vmem [thread:$0]  %s122_s23, 8192, %s124_s27, [#allocation15], %s2460_s24, %s2460_s24, %s2461_s25  }
  0x15   :  { %s57_s18 = sshll.u32 %s2686_s2, 4  ;;  %s2463_s20 = smov [#allocation2]   ;;  %s58_s18 = int_to_ptr.hbm [resolvable:$true] %s57_s18 }
  0x16   :  { %s37_s3 = sshll.u32 %s2463_s20, 4  ;;  %s2464_s9 = smov [#allocation7]   ;;  %s38_s3 = int_to_ptr.vmem [resolvable:$true] %s37_s3 }
  0x17   :  { %s59_s19 = sshll.u32 %s2464_s9, 4  ;;  %s81_s26 = sshll.u32 %s2688_s4, 4  ;;  %s60_s19 = int_to_ptr.vmem [resolvable:$true] %s59_s19  ;;  %s82_s26 = int_to_ptr.hbm [resolvable:$true] %s81_s26 }
  0x18   :  { %62 = dma.hbm_to_vmem [thread:$0]  %s58_s18, 128, %s60_s19, [#allocation6]  }
  0x19   :  { %s35_s0 = sshll.u32 %s2703_s30, 4  ;;  %s106_s24 = sshll.u32 %s2691_s7, 4  ;;  %s36_s0 = int_to_ptr.hbm [resolvable:$true] %s35_s0  ;;  %s107_s24 = int_to_ptr.hbm [resolvable:$true] %s106_s24 }
  0x1a   :  { %40 = dma.hbm_to_vmem [thread:$0]  %s36_s0, 128, %s38_s3, [#allocation3]  }
  0x1b   :  { %s2465_s25 = smov [#allocation10]   ;;  %s2466_s27 = smov [#allocation13]  }
  0x1c   :  { %s83_s2 = sshll.u32 %s2465_s25, 4  ;;  %s108_s0 = sshll.u32 %s2466_s27, 4  ;;  %s84_s2 = int_to_ptr.vmem [resolvable:$true] %s83_s2  ;;  %s109_s0 = int_to_ptr.vmem [resolvable:$true] %s108_s0 }
  0x1d   :  { %86 = dma.hbm_to_vmem [thread:$0]  %s82_s26, 16, %s84_s2, [#allocation9]  }
  0x1e   :  { %s2467_s28 = smov 256   ;;  %s2468_s30 = smov 16  }
  0x1f   :  { %114 = dma.hbm_to_vmem [thread:$0]  %s107_s24, 4096, %s109_s0, [#allocation12], %s2467_s28, %s2467_s28, %s2468_s30  }
  0x20   :  { %s136_s1 = sshll.u32 %s2695_s11, 4  ;;  %s2469_s18 = smov [#allocation16]   ;;  %s137_s1 = int_to_ptr.hbm [resolvable:$true] %s136_s1 }
  0x21   :  { %s138_s20 = sshll.u32 %s2469_s18, 4  ;;  %s2704_s7 = smov 64   ;;  %s139_s20 = int_to_ptr.vmem [resolvable:$true] %s138_s20 }
  0x22   :  { %144 = dma.hbm_to_vmem [thread:$0]  %s137_s1, 2048, %s139_s20, [#allocation15], %s2704_s7, %s2704_s7, %s2458_s17  }
  0x23   :  { %2439 = dma.done.wait [#allocation3], 128  }
  0x24   :  { %2440 = vsyncadd [#allocation3], 4294967168 }
  0x25   :  { %2441 = dma.done.wait [#allocation6], 256  }
  0x26   :  { %2442 = vsyncadd [#allocation6], 4294967040 }
  0x27   :  { %2443 = dma.done.wait [#allocation9], 272  }
  0x28   :  { %2444 = vsyncadd [#allocation9], 4294967024 }
  0x29   :  { %2445 = dma.done.wait [#allocation12], 4608  }
  0x2a   :  { %2446 = vsyncadd [#allocation12], 4294962688 }
  0x2b   :  { %2447 = dma.done.wait [#allocation15], 10240  }
  0x2c   :  { %2448 = vsyncadd [#allocation15], 4294957056  ;;  %v1949_v0 = vld [vmem:[#allocation8 + $0x8] sm:$0xff]  ;;  %v1948_v4 = vld [vmem:[#allocation8] sm:$0xff]  ;;  %vm208_vm0 = vcmask 261120   ;;  %s1413_s21 = sshll.u32 %s2698_s14, 4  ;;  %s1414_s21 = int_to_ptr.hbm [resolvable:$true] %s1413_s21 }
  0x2d   :  { %v1952_v1 = vld [vmem:[#allocation11 + $0x14] sm:$0xf]  ;;  %v1485_v2 = vld [vmem:[#allocation11 + $0x18] sm:$0xf0]  ;;  %v1950_v5 = vld [vmem:[#allocation11 + $0x4] sm:$0xf]  ;;  %218 = vmatpush.bf16.msra.mxu1 %v1949_v0 }
  0x2e   :  { %v1488_v3 = vor.u32 %v1952_v1, %v1485_v2  ;;  %v1477_v6 = vld [vmem:[#allocation11 + $0x8] sm:$0xf0]  ;;  %v184_v7 = vld [vmem:[#allocation2] sm:$0xff]  ;;  %v1483_v8 = vld [vmem:[#allocation11 + $0x10] sm:$0xf]  ;;  %s2470_s22 = smov [#allocation18]  }
  0x2f   :  { %v1953_v9 = vld [vmem:[#allocation11 + $0x14] sm:$0xf0]  ;;  %v1480_v10 = vor.u32 %v1950_v5, %v1477_v6  ;;  %v186_v12 = vld [vmem:[#allocation5] sm:$0xff]  ;;  %v1951_v14 = vld [vmem:[#allocation11 + $0x4] sm:$0xf0]  ;;  %v185_v15 = vpack.c.bf16 %v184_v7, %v184_v7  ;;  %s1411_s26 = sshll.u32 %s2470_s22, 4  ;;  %s1412_s26 = int_to_ptr.vmem [resolvable:$true] %s1411_s26 }
  0x30   :  { %296 = vmatpush.bf16.msra.mxu2 %v1488_v3  ;;  %v1484_v11 = vor.u32 %v1953_v9, %v1483_v8  ;;  %v1475_v13 = vld [vmem:[#allocation11] sm:$0xf]  ;;  %v187_v16 = vpack.c.bf16 %v186_v12, %v186_v12  ;;  %v1984_v19 = vld [vmem:[#allocation13 + $0xec] sm:$0xf0]  ;;  %v1982_v20 = vld [vmem:[#allocation13 + $0xe4] sm:$0xf] }
  0x31   :  { %219 = vmatpush.bf16.msra.mxu1 %v1948_v4  ;;  %v1476_v17 = vor.u32 %v1951_v14, %v1475_v13  ;;  %v1607_v18 = vld [vmem:[#allocation13 + $0xe0] sm:$0xf]  ;;  %v1609_v22 = vld [vmem:[#allocation13 + $0xf0] sm:$0xf0]  ;;  %v1615_v23 = vld [vmem:[#allocation13 + $0xe8] sm:$0xf] }
  0x32   :  { %v1608_v21 = vor.u32 %v1984_v19, %v1607_v18  ;;  %v1985_v24 = vld [vmem:[#allocation13 + $0xf4] sm:$0xf0]  ;;  %v1612_v25 = vor.u32 %v1982_v20, %v1609_v22  ;;  %v1983_v27 = vld [vmem:[#allocation13 + $0xec] sm:$0xf]  ;;  %v1617_v28 = vld [vmem:[#allocation13 + $0xf8] sm:$0xf0] }
  0x33   :  { %v1616_v26 = vor.u32 %v1985_v24, %v1615_v23  ;;  %v1620_v29 = vor.u32 %v1983_v27, %v1617_v28  ;;  %v1591_v30 = vld [vmem:[#allocation13 + $0xc0] sm:$0xf]  ;;  %v1980_v31 = vld [vmem:[#allocation13 + $0xcc] sm:$0xf0]  ;;  %v1978_v32 = vld [vmem:[#allocation13 + $0xc4] sm:$0xf] }
  0x34   :  { %297 = vmatpush.bf16.msra.mxu2 %v1480_v10  ;;  %1471 = vmatmul.msk.bf16.vlgmr.msra.gmra.mxu1 %vm208_vm0, %v185_v15  ;;  %v1592_v33 = vor.u32 %v1980_v31, %v1591_v30  ;;  %v1593_v34 = vld [vmem:[#allocation13 + $0xd0] sm:$0xf0]  ;;  %v1599_v35 = vld [vmem:[#allocation13 + $0xc8] sm:$0xf]  ;;  %v1981_v36 = vld [vmem:[#allocation13 + $0xd4] sm:$0xf0] }
  0x35   :  { %283 = vmatpush.bf16.msrb.mxu1 %v1484_v11  ;;  %548 = vmatpush.bf16.msra.mxu3 %v1608_v21  ;;  %v1596_v37 = vor.u32 %v1978_v32, %v1593_v34  ;;  %v1600_v38 = vor.u32 %v1981_v36, %v1599_v35  ;;  %v1979_v39 = vld [vmem:[#allocation13 + $0xcc] sm:$0xf]  ;;  %v1601_v40 = vld [vmem:[#allocation13 + $0xd8] sm:$0xf0]  ;;  %v2595_v42 = vld [vmem:[%s2690_s6] sm:$0x3] }
  0x36   :  { %561 = vmatpush.bf16.msra.mxu0 %v1612_v25  ;;  %v2085_v41 = vld [vmem:[#allocation10] ss:$0 sm:$0xff]  ;;  %v1604_v43 = vor.u32 %v1979_v39, %v1601_v40  ;;  %v1575_v44 = vld [vmem:[#allocation13 + $0xa0] sm:$0xf]  ;;  %v1976_v45 = vld [vmem:[#allocation13 + $0xac] sm:$0xf0] }
  0x37   :  { %1490 = vmatmul.msk.bf16.vlgmr.msra.gmra.mxu2 %vm208_vm0, %v187_v16  ;;  %v1974_v46 = vld [vmem:[#allocation13 + $0xa4] sm:$0xf]  ;;  %v1576_v47 = vor.u32 %v1976_v45, %v1575_v44  ;;  %v1577_v48 = vld [vmem:[#allocation13 + $0xb0] sm:$0xf0]  ;;  %v1583_v49 = vld [vmem:[#allocation13 + $0xa8] sm:$0xf] }
  0x38   :  { %587 = vmatpush.bf16.msrb.mxu2 %v1620_v29  ;;  %v1977_v50 = vld [vmem:[#allocation13 + $0xb4] sm:$0xf0]  ;;  %v1580_v52 = vor.u32 %v1974_v46, %v1577_v48  ;;  %v1975_v54 = vld [vmem:[#allocation13 + $0xac] sm:$0xf]  ;;  %v1585_v55 = vld [vmem:[#allocation13 + $0xb8] sm:$0xf0] }
  0x39   :  { %284 = vmatpush.bf16.msrb.mxu1 %v1476_v17  ;;  %549 = vmatpush.bf16.msra.mxu3 %v1592_v33  ;;  %v1584_v53 = vor.u32 %v1977_v50, %v1583_v49  ;;  %v251_v57 = vperm.slane %v2595_v42, 1  ;;  %v1588_v58 = vor.u32 %v1975_v54, %v1585_v55  ;;  %v1559_v59 = vld [vmem:[#allocation13 + $0x80] sm:$0xf]  ;;  %v1972_v60 = vld [vmem:[#allocation13 + $0x8c] sm:$0xf0]  ;;  %v250_v32 = vperm.slane %v2595_v42, 0 }
  0x3a   :  { %562 = vmatpush.bf16.msra.mxu0 %v1596_v37  ;;  %v1970_v61 = vld [vmem:[#allocation13 + $0x84] sm:$0xf]  ;;  %v1560_v63 = vor.u32 %v1972_v60, %v1559_v59  ;;  %v1561_v0 = vld [vmem:[#allocation13 + $0x90] sm:$0xf0]  ;;  %v1567_v1 = vld [vmem:[#allocation13 + $0x88] sm:$0xf] }
  0x3b   :  { %v1564_v2 = vor.u32 %v1970_v61, %v1561_v0  ;;  %v1973_v3 = vld [vmem:[#allocation13 + $0x94] sm:$0xf0]  ;;  %v1971_v4 = vld [vmem:[#allocation13 + $0x8c] sm:$0xf]  ;;  %v1569_v5 = vld [vmem:[#allocation13 + $0x98] sm:$0xf0] }
  0x3c   :  { %588 = vmatpush.bf16.msrb.mxu2 %v1604_v43  ;;  %v1568_v6 = vor.u32 %v1973_v3, %v1567_v1  ;;  %v1572_v7 = vor.u32 %v1971_v4, %v1569_v5  ;;  %v1543_v8 = vld [vmem:[#allocation13 + $0x60] sm:$0xf]  ;;  %v1968_v9 = vld [vmem:[#allocation13 + $0x6c] sm:$0xf0]  ;;  %v1966_v10 = vld [vmem:[#allocation13 + $0x64] sm:$0xf] }
  0x3d   :  { %574 = vmatpush.bf16.msra.mxu1 %v1616_v26  ;;  %550 = vmatpush.bf16.msra.mxu3 %v1576_v47  ;;  %v1544_v12 = vor.u32 %v1968_v9, %v1543_v8  ;;  %v1545_v13 = vld [vmem:[#allocation13 + $0x70] sm:$0xf0]  ;;  %v1551_v14 = vld [vmem:[#allocation13 + $0x68] sm:$0xf]  ;;  %v1969_v15 = vld [vmem:[#allocation13 + $0x74] sm:$0xf0] }
  0x3e   :  { %563 = vmatpush.bf16.msra.mxu0 %v1580_v52  ;;  %v1548_v18 = vor.u32 %v1966_v10, %v1545_v13  ;;  %v1552_v19 = vor.u32 %v1969_v15, %v1551_v14  ;;  %v1967_v20 = vld [vmem:[#allocation13 + $0x6c] sm:$0xf]  ;;  %v1553_v21 = vld [vmem:[#allocation13 + $0x78] sm:$0xf0]  ;;  %v1527_v24 = vld [vmem:[#allocation13 + $0x40] sm:$0xf] }
  0x3f   :  { %v1556_v22 = vor.u32 %v1967_v20, %v1553_v21  ;;  %v1964_v25 = vld [vmem:[#allocation13 + $0x4c] sm:$0xf0]  ;;  %v1962_v28 = vld [vmem:[#allocation13 + $0x44] sm:$0xf]  ;;  %v1529_v29 = vld [vmem:[#allocation13 + $0x50] sm:$0xf0] }
  0x40   :  { %589 = vmatpush.bf16.msrb.mxu2 %v1588_v58  ;;  %v1528_v27 = vor.u32 %v1964_v25, %v1527_v24  ;;  %v1535_v30 = vld [vmem:[#allocation13 + $0x48] sm:$0xf]  ;;  %v1532_v33 = vor.u32 %v1962_v28, %v1529_v29  ;;  %v1965_v34 = vld [vmem:[#allocation13 + $0x54] sm:$0xf0]  ;;  %v1963_v35 = vld [vmem:[#allocation13 + $0x4c] sm:$0xf] }
  0x41   :  { %575 = vmatpush.bf16.msra.mxu1 %v1600_v38  ;;  %551 = vmatpush.bf16.msra.mxu3 %v1560_v63  ;;  %v1536_v36 = vor.u32 %v1965_v34, %v1535_v30  ;;  %v1537_v37 = vld [vmem:[#allocation13 + $0x58] sm:$0xf0]  ;;  %v1511_v38 = vld [vmem:[#allocation13 + $0x20] sm:$0xf]  ;;  %v1960_v39 = vld [vmem:[#allocation13 + $0x2c] sm:$0xf0] }
  0x42   :  { %564 = vmatpush.bf16.msra.mxu0 %v1564_v2  ;;  %v1540_v40 = vor.u32 %v1963_v35, %v1537_v37  ;;  %v1513_v43 = vld [vmem:[#allocation13 + $0x30] sm:$0xf0]  ;;  %v1512_v45 = vor.u32 %v1960_v39, %v1511_v38  ;;  %v1519_v47 = vld [vmem:[#allocation13 + $0x28] sm:$0xf]  ;;  %v1961_v42 = vld [vmem:[#allocation13 + $0x34] sm:$0xf0] }
  0x43   :  { %v1959_v48 = vld [vmem:[#allocation13 + $0x2c] sm:$0xf]  ;;  %v1520_v50 = vor.u32 %v1961_v42, %v1519_v47  ;;  %v1495_v52 = vld [vmem:[#allocation13] sm:$0xf]  ;;  %v1956_v55 = vld [vmem:[#allocation13 + $0xc] sm:$0xf0] }
  0x44   :  { %1489 = vmatmul.msk.bf16.vlgmr.msrb.gmra.mxu1 %vm208_vm0, %v187_v16  ;;  %590 = vmatpush.bf16.msrb.mxu2 %v1572_v7  ;;  %v1496_v59 = vor.u32 %v1956_v55, %v1495_v52  ;;  %v1503_v61 = vld [vmem:[#allocation13 + $0x8] sm:$0xf]  ;;  %v1955_v63 = vld [vmem:[#allocation13 + $0xc] sm:$0xf]  ;;  %v1505_v3 = vld [vmem:[#allocation13 + $0x18] sm:$0xf0] }
  0x45   :  { %576 = vmatpush.bf16.msra.mxu1 %v1584_v53  ;;  %552 = vmatpush.bf16.msra.mxu3 %v1544_v12  ;;  %v2033_v20 = vld [vmem:[#allocation14 + $0x174] sm:$0xf0]  ;;  %v1739_v21 = vld [vmem:[#allocation14 + $0xe0] sm:$0xf]  ;;  %v1683_v28 = vld [vmem:[#allocation14 + $0x70] sm:$0xf] }
  0x46   :  { %565 = vmatpush.bf16.msra.mxu0 %v1548_v18  ;;  %v1811_v18 = vld [vmem:[#allocation14 + $0x170] sm:$0xf]  ;;  %v2049_v35 = vld [vmem:[#allocation14 + $0x1f4] sm:$0xf0]  ;;  %v1675_v42 = vld [vmem:[#allocation14 + $0x60] sm:$0xf] }
  0x47   :  { %v1812_v25 = vor.u32 %v2033_v20, %v1811_v18  ;;  %v1875_v34 = vld [vmem:[#allocation14 + $0x1f0] sm:$0xf]  ;;  %v2047_v52 = vld [vmem:[#allocation14 + $0x1e4] sm:$0xf0]  ;;  %v1997_v18 = vld [vmem:[#allocation14 + $0x54] sm:$0xf0] }
  0x48   :  { %591 = vmatpush.bf16.msrb.mxu2 %v1556_v22  ;;  %v2015_v22 = vld [vmem:[#allocation14 + $0xe4] sm:$0xf0]  ;;  %v1876_v39 = vor.u32 %v2049_v35, %v1875_v34  ;;  %v1707_v35 = vld [vmem:[#allocation14 + $0xa0] sm:$0xf]  ;;  %s2471_s29 = smov [#allocation20]   ;;  %s1424_s2 = sshll.u32 %s2699_s15, 4  ;;  %s1425_s2 = int_to_ptr.hbm [resolvable:$true] %s1424_s2 }
  0x49   :  { %577 = vmatpush.bf16.msra.mxu1 %v1568_v6  ;;  %553 = vmatpush.bf16.msra.mxu3 %v1528_v27  ;;  %v1508_v6 = vor.u32 %v1955_v63, %v1505_v3  ;;  %v2031_v27 = vld [vmem:[#allocation14 + $0x164] sm:$0xf0]  ;;  %s1422_s23 = sshll.u32 %s2471_s29, 4  ;;  %s1435_s28 = sshll.u32 %s2700_s16, 4  ;;  %s1423_s23 = int_to_ptr.vmem [resolvable:$true] %s1422_s23  ;;  %s1436_s28 = int_to_ptr.hbm [resolvable:$true] %s1435_s28 }
  0x4a   :  { %566 = vmatpush.bf16.msra.mxu0 %v1532_v33  ;;  %v2001_v33 = vld [vmem:[#allocation14 + $0x74] sm:$0xf0]  ;;  %s2472_s30 = smov [#allocation21]   ;;  %s2473_s15 = smov [#allocation17]  }
  0x4b   :  { %v1684_v38 = vor.u32 %v2001_v33, %v1683_v28  ;;  %v2043_v33 = vld [vmem:[#allocation14 + $0x1c4] sm:$0xf0]  ;;  %s1433_s14 = sshll.u32 %s2472_s30, 4  ;;  %s1400_s16 = sshll.u32 %s2473_s15, 4  ;;  %s1434_s14 = int_to_ptr.vmem [resolvable:$true] %s1433_s14  ;;  %s1401_s16 = int_to_ptr.vmem [resolvable:$true] %s1400_s16 }
  0x4c   :  { %592 = vmatpush.bf16.msrb.mxu2 %v1540_v40  ;;  %v1731_v40 = vld [vmem:[#allocation14 + $0xd0] sm:$0xf]  ;;  %s1402_s18 = sshll.u32 %s2697_s13, 4  ;;  %s1403_s18 = int_to_ptr.hbm [resolvable:$true] %s1402_s18 }
  0x4d   :  { %578 = vmatpush.bf16.msra.mxu1 %v1552_v19  ;;  %554 = vmatpush.bf16.msra.mxu3 %v1512_v45  ;;  %v1795_v45 = vld [vmem:[#allocation14 + $0x150] sm:$0xf] }
  0x51   :  { %579 = vmatpush.bf16.msra.mxu1 %v1536_v36  ;;  %555 = vmatpush.bf16.msra.mxu3 %v1496_v59 }
  0x55   :  { %580 = vmatpush.bf16.msra.mxu1 %v1520_v50  ;;  %1070 = vmatpush.bf16.msrb.mxu3 %v1684_v38  ;;  %v1999_v50 = vld [vmem:[#allocation14 + $0x64] sm:$0xf0] }
  0x56   :  { %v1676_v55 = vor.u32 %v1999_v50, %v1675_v42  ;;  %v1699_v42 = vld [vmem:[#allocation14 + $0x90] sm:$0xf] }
  0x59   :  { %1071 = vmatpush.bf16.msrb.mxu3 %v1676_v55  ;;  %v1835_v55 = vld [vmem:[#allocation14 + $0x1a0] sm:$0xf] }
  0xb1   :  { %v221_v51 = vpop.f32.mrf.mxu1 }
  0xb2   :  { %v222_v56 = vadd.f32 %v2085_v41, %v221_v51  ;;  %v1958_v41 = vld [vmem:[#allocation13 + $0x24] sm:$0xf]  ;;  %v1521_v51 = vld [vmem:[#allocation13 + $0x38] sm:$0xf0] }
  0xb3   :  { %v1516_v46 = vor.u32 %v1958_v41, %v1513_v43  ;;  %v1524_v54 = vor.u32 %v1959_v48, %v1521_v51  ;;  %v2013_v41 = vld [vmem:[#allocation14 + $0xd4] sm:$0xf0]  ;;  %v1867_v51 = vld [vmem:[#allocation14 + $0x1e0] sm:$0xf] }
  0xb4   :  { %v1472_v62 = vmul.f32 -1.442695, %v222_v56  ;;  %v1954_v56 = vld [vmem:[#allocation13 + $0x4] sm:$0xf] }
  0xb5   :  { %567 = vmatpush.bf16.msra.mxu0 %v1516_v46  ;;  %593 = vmatpush.bf16.msrb.mxu2 %v1524_v54  ;;  %v2029_v46 = vld [vmem:[#allocation14 + $0x154] sm:$0xf0] }
  0xb6   :  { %2087 = vpow2.f32 %v1472_v62  ;;  %v1957_v62 = vld [vmem:[#allocation13 + $0x14] sm:$0xf0]  ;;  %v1796_v54 = vor.u32 %v2029_v46, %v1795_v45 }
  0xb7   :  { %v1504_v2 = vor.u32 %v1957_v62, %v1503_v61  ;;  %v2041_v46 = vld [vmem:[#allocation14 + $0x1b4] sm:$0xf0] }
  0xb9   :  { %v223_v17 = vpop.f32.mrf.mxu1  ;;  %581 = vmatpush.bf16.msra.mxu1 %v1504_v2  ;;  %594 = vmatpush.bf16.msrb.mxu2 %v1508_v6 }
  0xba   :  { %v299_v11 = vpop.f32.mrf.mxu2  ;;  %v2017_v17 = vld [vmem:[#allocation14 + $0xf4] sm:$0xf0] }
  0xbb   :  { %v300_v16 = vadd.f32 %v299_v11, %v251_v57  ;;  %v1497_v57 = vld [vmem:[#allocation13 + $0x10] sm:$0xf0] }
  0xbc   :  { %v2088_v26 = vpop.eup %2087  ;;  %v1500_v60 = vor.u32 %v1954_v56, %v1497_v57  ;;  %v1868_v56 = vor.u32 %v2047_v52, %v1867_v51  ;;  %v2021_v51 = vld [vmem:[#allocation14 + $0x114] sm:$0xf0] }
  0xbd   :  { %v1492_v23 = vmul.f32 -1.442695, %v300_v16  ;;  %v2598_v31 = vadd.f32 1.0, %v2088_v26  ;;  %v1747_v16 = vld [vmem:[#allocation14 + $0xf0] sm:$0xf]  ;;  %1096 = vmatpush.bf16.msrb.mxu1 %v1812_v25  ;;  %1109 = vmatpush.bf16.msra.mxu2 %v1876_v39 }
  0xbe   :  { %568 = vmatpush.bf16.msra.mxu0 %v1500_v60  ;;  %v1748_v19 = vor.u32 %v2017_v17, %v1747_v16  ;;  %v1803_v26 = vld [vmem:[#allocation14 + $0x160] sm:$0xf]  ;;  %v1667_v17 = vld [vmem:[#allocation14 + $0x50] sm:$0xf]  ;;  %v2023_v39 = vld [vmem:[#allocation14 + $0x124] sm:$0xf0] }
  0xbf   :  { %2089 = vpow2.f32 %v1492_v23  ;;  %v240_v5 = vand.u32 2147483648, %v2598_v31  ;;  %v238_v7 = vand.u32 2147483647, %v2598_v31  ;;  %vm234_vm2 = vweird.f32 %v2598_v31  ;;  %v1779_v25 = vld [vmem:[#allocation14 + $0x130] sm:$0xf] }
  0xc0   :  { %2091 = vrcp.f32 %v2598_v31  ;;  %v1668_v20 = vor.u32 %v1997_v18, %v1667_v17  ;;  %v2030_v17 = vld [vmem:[#allocation14 + $0x164] sm:$0xf] }
  0xc1   :  { %v286_v49 = vpop.f32.mrf.mxu1  ;;  %v241_v11 = vor.u32 1.1754944e-38, %v240_v5  ;;  %vm2614_vm4 = vcmp.eq.f32.partialorder %v238_v7, 8.507059e+37  ;;  %1110 = vmatpush.bf16.msra.mxu2 %v1868_v56  ;;  %v343_v7 = vld [vmem:[#allocation7] sm:$0xff]  ;;  %v2628_v56 = vld [vmem:[%s2692_s8] sm:$0xf] }
  0xc2   :  { %v301_v44 = vpop.f32.mrf.mxu2  ;;  %v287_v53 = vadd.f32 %v286_v49, %v250_v32  ;;  %1083 = vmatpush.bf16.msrb.mxu0 %v1748_v19  ;;  %v1804_v32 = vor.u32 %v2031_v27, %v1803_v26  ;;  %v1732_v49 = vor.u32 %v2013_v41, %v1731_v40  ;;  %v1859_v19 = vld [vmem:[#allocation14 + $0x1d0] sm:$0xf]  ;;  %1072 = vmatpush.bf16.msrb.mxu3 %v1668_v20  ;;  %v2025_v27 = vld [vmem:[#allocation14 + $0x134] sm:$0xf0]  ;;  %v1627_v20 = vld [vmem:[#allocation14] sm:$0xf] }
  0xc3   :  { %v1780_v28 = vor.u32 %v2025_v27, %v1779_v25  ;;  %v1651_v41 = vld [vmem:[#allocation14 + $0x30] sm:$0xf]  ;;  %v2035_v25 = vld [vmem:[#allocation14 + $0x184] sm:$0xf0] }
  0xc4   :  { %v1491_v1 = vmul.f32 -1.442695, %v287_v53  ;;  %1097 = vmatpush.bf16.msrb.mxu1 %v1804_v32 }
  0xc5   :  { %v2090_v58 = vpop.eup %2089 }
  0xc6   :  { %v2602_v0 = vadd.f32 1.0, %v2090_v58  ;;  %v2092_v4 = vpop.eup %2091 }
  0xc7   :  { %v230_v8 = vmul.f32 %v2092_v4, %v2598_v31  ;;  %vm235_vm1 = vweird.f32 %v2092_v4  ;;  %v1740_v31 = vor.u32 %v2015_v22, %v1739_v21  ;;  %v2045_v21 = vld [vmem:[#allocation14 + $0x1d4] sm:$0xf0] }
  0xc8   :  { %2093 = vrcp.f32 %v2602_v0  ;;  %vm2609_vm3 = vmor %vm234_vm2, %vm235_vm1  ;;  %v337_v12 = vand.u32 2147483648, %v2602_v0  ;;  %v335_v47 = vand.u32 2147483647, %v2602_v0  ;;  %vm331_vm5 = vweird.f32 %v2602_v0  ;;  %1098 = vmatpush.bf16.msrb.mxu1 %v1796_v54  ;;  %v1991_v54 = vld [vmem:[#allocation14 + $0x24] sm:$0xf0] }
  0xc9   :  { %2095 = vpow2.f32 %v1491_v1  ;;  %v231_v9 = vsub.f32 1.0, %v230_v8  ;;  %v288_v13 = vpop.f32.mrf.mxu1  ;;  %1084 = vmatpush.bf16.msrb.mxu0 %v1740_v31  ;;  %v1860_v22 = vor.u32 %v2045_v21, %v1859_v19  ;;  %v1851_v31 = vld [vmem:[#allocation14 + $0x1c0] sm:$0xf]  ;;  %v1805_v19 = vld [vmem:[#allocation14 + $0x168] sm:$0xf0] }
  0xca   :  { %v338_v53 = vor.u32 1.1754944e-38, %v337_v12  ;;  %vm336_vm8 = vcmp.eq.f32.partialorder %v335_v47, 8.507059e+37  ;;  %v2011_v12 = vld [vmem:[#allocation14 + $0xc4] sm:$0xf0]  ;;  %v1787_v13 = vld [vmem:[#allocation14 + $0x140] sm:$0xf]  ;;  %v1852_v34 = vor.u32 %v2043_v33, %v1851_v31 }
  0xcb   :  { %v232_v15 = vmul.f32 %v2092_v4, %v231_v9  ;;  %1111 = vmatpush.bf16.msra.mxu2 %v1860_v22  ;;  %v1987_v21 = vld [vmem:[#allocation14 + $0x4] sm:$0xf0]  ;;  %v1808_v22 = vor.u32 %v2030_v17, %v1805_v19  ;;  %v2012_v33 = vld [vmem:[#allocation14 + $0xd4] sm:$0xf]  ;;  %v1773_v19 = vld [vmem:[#allocation14 + $0x128] sm:$0xf0] }
  0xcd   :  { %v233_v24 = vadd.f32 %v2092_v4, %v232_v15  ;;  %1085 = vmatpush.bf16.msrb.mxu0 %v1732_v49  ;;  %v2027_v15 = vld [vmem:[#allocation14 + $0x144] sm:$0xf0]  ;;  %v1763_v49 = vld [vmem:[#allocation14 + $0x110] sm:$0xf] }
  0xce   :  { %v2094_v23 = vpop.eup %2093  ;;  %v1788_v16 = vor.u32 %v2027_v15, %v1787_v13  ;;  %v1764_v52 = vor.u32 %v2021_v51, %v1763_v49  ;;  %v2014_v15 = vld [vmem:[#allocation14 + $0xe4] sm:$0xf] }
  0xcf   :  { %v2096_v29 = vpop.eup %2095  ;;  %v327_v30 = vmul.f32 %v2094_v23, %v2602_v0  ;;  %v237_v37 = vsel %vm2609_vm3, %v2092_v4, %v233_v24  ;;  %vm332_vm6 = vweird.f32 %v2094_v23  ;;  %v2009_v24 = vld [vmem:[#allocation14 + $0xb4] sm:$0xf0]  ;;  %1112 = vmatpush.bf16.msra.mxu2 %v1852_v34  ;;  %v1733_v34 = vld [vmem:[#allocation14 + $0xd8] sm:$0xf0] }
  0xd0   :  { %v306_v36 = vadd.f32 1.0, %v2096_v29  ;;  %v242_v44 = vsel %vm2614_vm4, %v241_v11, %v237_v37  ;;  %vm333_vm7 = vmor %vm331_vm5, %vm332_vm6  ;;  %v1723_v11 = vld [vmem:[#allocation14 + $0xc0] sm:$0xf]  ;;  %1099 = vmatpush.bf16.msrb.mxu1 %v1788_v16  ;;  %v1741_v16 = vld [vmem:[#allocation14 + $0xe8] sm:$0xf0] }
  0xd1   :  { %v328_v43 = vsub.f32 1.0, %v327_v30  ;;  %1392 = vst [vmem:[#allocation18] sm:$0xff] %v242_v44  ;;  %v1724_v14 = vor.u32 %v2011_v12, %v1723_v11  ;;  %v1659_v29 = vld [vmem:[#allocation14 + $0x40] sm:$0xf]  ;;  %v1995_v30 = vld [vmem:[#allocation14 + $0x44] sm:$0xf0]  ;;  %v1744_v18 = vor.u32 %v2014_v15, %v1741_v16 }
  0xd2   :  { %2097 = vrcp.f32 %v306_v36  ;;  %v318_v63 = vand.u32 2147483648, %v306_v36  ;;  %v316_v1 = vand.u32 2147483647, %v306_v36  ;;  %vm312_vm10 = vweird.f32 %v306_v36  ;;  %v1771_v37 = vld [vmem:[#allocation14 + $0x120] sm:$0xf] }
  0xd3   :  { %v329_v48 = vmul.f32 %v2094_v23, %v328_v43  ;;  %1086 = vmatpush.bf16.msrb.mxu0 %v1724_v14  ;;  %v1660_v32 = vor.u32 %v1995_v30, %v1659_v29  ;;  %v1772_v40 = vor.u32 %v2023_v39, %v1771_v37  ;;  %v1993_v43 = vld [vmem:[#allocation14 + $0x34] sm:$0xf0]  ;;  %v381_v12 = vperm.slane %v2628_v56, 1  ;;  %v2048_v29 = vld [vmem:[#allocation14 + $0x1f4] sm:$0xf] }
  0xd4   :  { %v319_v3 = vor.u32 1.1754944e-38, %v318_v63  ;;  %vm317_vm12 = vcmp.eq.f32.partialorder %v316_v1, 8.507059e+37  ;;  %1100 = vmatpush.bf16.msrb.mxu1 %v1780_v28  ;;  %v1652_v45 = vor.u32 %v1993_v43, %v1651_v41  ;;  %v2016_v1 = vld [vmem:[#allocation14 + $0xf4] sm:$0xf]  ;;  %v2037_v11 = vld [vmem:[#allocation14 + $0x194] sm:$0xf0]  ;;  %v1736_v39 = vor.u32 %v2012_v33, %v1733_v34 }
  0xd5   :  { %v330_v57 = vadd.f32 %v2094_v23, %v329_v48  ;;  %1073 = vmatpush.bf16.msrb.mxu3 %v1660_v32  ;;  %v2005_v48 = vld [vmem:[#allocation14 + $0x94] sm:$0xf0]  ;;  %v1685_v28 = vld [vmem:[#allocation14 + $0x78] sm:$0xf0]  ;;  %v380_v37 = vperm.slane %v2628_v56, 0 }
  0xd6   :  { %v1700_v50 = vor.u32 %v2005_v48, %v1699_v42  ;;  %v1877_v30 = vld [vmem:[#allocation14 + $0x1f8] sm:$0xf0]  ;;  %v1998_v43 = vld [vmem:[#allocation14 + $0x64] sm:$0xf]  ;;  %v1725_v48 = vld [vmem:[#allocation14 + $0xc8] sm:$0xf0] }
  0xd7   :  { %v334_v58 = vsel %vm333_vm7, %v2094_v23, %v330_v57  ;;  %v1715_v23 = vld [vmem:[#allocation14 + $0xb0] sm:$0xf]  ;;  %v1880_v32 = vor.u32 %v2048_v29, %v1877_v30  ;;  %v2010_v42 = vld [vmem:[#allocation14 + $0xc4] sm:$0xf]  ;;  %1416 = dma.vmem_to_hbm [thread:$0]  %s1412_s26, 128, %s1414_s21, [#allocation19]  }
  0xd8   :  { %v2098_v59 = vpop.eup %2097  ;;  %v339_v60 = vsel %vm336_vm8, %v338_v53, %v334_v58  ;;  %v1716_v26 = vor.u32 %v2009_v24, %v1715_v23  ;;  %1101 = vmatpush.bf16.msrb.mxu1 %v1772_v40  ;;  %v1643_v53 = vld [vmem:[#allocation14 + $0x20] sm:$0xf]  ;;  %v2039_v58 = vld [vmem:[#allocation14 + $0x1a4] sm:$0xf0]  ;;  %v1628_v23 = vor.u32 %v1987_v21, %v1627_v20  ;;  %v1797_v40 = vld [vmem:[#allocation14 + $0x158] sm:$0xf0]  ;;  %v1728_v51 = vor.u32 %v2010_v42, %v1725_v48 }
  0xd9   :  { %v308_v61 = vmul.f32 %v2098_v59, %v306_v36  ;;  %1393 = vst [vmem:[#allocation20] sm:$0xff] %v339_v60  ;;  %vm313_vm9 = vweird.f32 %v2098_v59  ;;  %v2007_v36 = vld [vmem:[#allocation14 + $0xa4] sm:$0xf0]  ;;  %1074 = vmatpush.bf16.msrb.mxu3 %v1652_v45  ;;  %v1644_v57 = vor.u32 %v1991_v54, %v1643_v53  ;;  %v1819_v24 = vld [vmem:[#allocation14 + $0x180] sm:$0xf] }
  0xda   :  { %vm314_vm11 = vmor %vm312_vm10, %vm313_vm9  ;;  %1087 = vmatpush.bf16.msrb.mxu0 %v1716_v26  ;;  %v1708_v38 = vor.u32 %v2007_v36, %v1707_v35  ;;  %v2000_v26 = vld [vmem:[#allocation14 + $0x74] sm:$0xf]  ;;  %v1820_v27 = vor.u32 %v2035_v25, %v1819_v24  ;;  %v382_v36 = vperm.slane %v2628_v56, 2  ;;  %v2046_v45 = vld [vmem:[#allocation14 + $0x1e4] sm:$0xf] }
  0xdb   :  { %v309_v62 = vsub.f32 1.0, %v308_v61  ;;  %v2003_v61 = vld [vmem:[#allocation14 + $0x84] sm:$0xf0]  ;;  %v1688_v31 = vor.u32 %v2000_v26, %v1685_v28  ;;  %v2028_v35 = vld [vmem:[#allocation14 + $0x154] sm:$0xf] }
  0xdc   :  { %1102 = vmatpush.bf16.msrb.mxu1 %v1764_v52  ;;  %v1800_v41 = vor.u32 %v2028_v35, %v1797_v40  ;;  %v2026_v52 = vld [vmem:[#allocation14 + $0x144] sm:$0xf]  ;;  %v1789_v53 = vld [vmem:[#allocation14 + $0x148] sm:$0xf0]  ;;  %v1996_v54 = vld [vmem:[#allocation14 + $0x54] sm:$0xf] }
  0xdd   :  { %v310_v0 = vmul.f32 %v2098_v59, %v309_v62  ;;  %v1755_v62 = vld [vmem:[#allocation14 + $0x100] sm:$0xf]  ;;  %1075 = vmatpush.bf16.msrb.mxu3 %v1644_v57  ;;  %v1992_v26 = vld [vmem:[#allocation14 + $0x34] sm:$0xf]  ;;  %v1990_v40 = vld [vmem:[#allocation14 + $0x24] sm:$0xf] }
  0xde   :  { %1088 = vmatpush.bf16.msrb.mxu0 %v1708_v38  ;;  %v383_v38 = vperm.slane %v2628_v56, 3  ;;  %v2040_v28 = vld [vmem:[#allocation14 + $0x1b4] sm:$0xf]  ;;  %v2002_v48 = vld [vmem:[#allocation14 + $0x84] sm:$0xf] }
  0xdf   :  { %v311_v2 = vadd.f32 %v2098_v59, %v310_v0  ;;  %v2019_v0 = vld [vmem:[#allocation14 + $0x104] sm:$0xf0]  ;;  %1427 = dma.vmem_to_hbm [thread:$0]  %s1423_s23, 128, %s1425_s2, [#allocation19]  }
  0xe1   :  { %v315_v4 = vsel %vm314_vm11, %v2098_v59, %v311_v2  ;;  %v1836_v59 = vor.u32 %v2039_v58, %v1835_v55  ;;  %v1749_v2 = vld [vmem:[#allocation14 + $0xf8] sm:$0xf0]  ;;  %v1792_v58 = vor.u32 %v2026_v52, %v1789_v53  ;;  %v2018_v53 = vld [vmem:[#allocation14 + $0x104] sm:$0xf] }
  0xe2   :  { %v320_v5 = vsel %vm317_vm12, %v319_v3, %v315_v4  ;;  %1089 = vmatpush.bf16.msrb.mxu0 %v1700_v50  ;;  %v1756_v3 = vor.u32 %v2019_v0, %v1755_v62  ;;  %v1752_v4 = vor.u32 %v2016_v1, %v1749_v2  ;;  %v2008_v1 = vld [vmem:[#allocation14 + $0xb4] sm:$0xf]  ;;  %v1717_v2 = vld [vmem:[#allocation14 + $0xb8] sm:$0xf0] }
  0xe3   :  { %v341_v6 = vsub.f32 %v242_v44, %v320_v5  ;;  %1394 = vst [vmem:[#allocation21] sm:$0xff] %v320_v5  ;;  %v1843_v44 = vld [vmem:[#allocation14 + $0x1b0] sm:$0xf]  ;;  %v2032_v5 = vld [vmem:[#allocation14 + $0x174] sm:$0xf] }
  0xe4   :  { %v1844_v47 = vor.u32 %v2041_v46, %v1843_v44  ;;  %1103 = vmatpush.bf16.msrb.mxu1 %v1756_v3  ;;  %v1677_v44 = vld [vmem:[#allocation14 + $0x68] sm:$0xf0]  ;;  %v2024_v3 = vld [vmem:[#allocation14 + $0x134] sm:$0xf]  ;;  %1438 = dma.vmem_to_hbm [thread:$0]  %s1434_s14, 128, %s1436_s28, [#allocation22]  }
  0xe5   :  { %v342_v8 = vmul.f32 %v341_v6, %v339_v60  ;;  %v1691_v60 = vld [vmem:[#allocation14 + $0x80] sm:$0xf]  ;;  %v1813_v6 = vld [vmem:[#allocation14 + $0x178] sm:$0xf0]  ;;  %v1680_v46 = vor.u32 %v1998_v43, %v1677_v44 }
  0xe6   :  { %1113 = vmatpush.bf16.msra.mxu2 %v1844_v47  ;;  %v1692_v63 = vor.u32 %v2003_v61, %v1691_v60  ;;  %v1869_v47 = vld [vmem:[#allocation14 + $0x1e8] sm:$0xf0]  ;;  %v2044_v60 = vld [vmem:[#allocation14 + $0x1d4] sm:$0xf]  ;;  %v1861_v61 = vld [vmem:[#allocation14 + $0x1d8] sm:$0xf0] }
  0xe7   :  { %v344_v9 = vmul.f32 %v343_v7, %v342_v8  ;;  %v1635_v7 = vld [vmem:[#allocation14 + $0x10] sm:$0xf]  ;;  %v1816_v8 = vor.u32 %v2032_v5, %v1813_v6  ;;  %v1872_v50 = vor.u32 %v2046_v45, %v1869_v47  ;;  %v1864_v0 = vor.u32 %v2044_v60, %v1861_v61  ;;  %v1781_v6 = vld [vmem:[#allocation14 + $0x138] sm:$0xf0]  ;;  %v1837_v47 = vld [vmem:[#allocation14 + $0x1a8] sm:$0xf0] }
  0xe8   :  { %1090 = vmatpush.bf16.msrb.mxu0 %v1692_v63  ;;  %v1720_v5 = vor.u32 %v2008_v1, %v1717_v2  ;;  %v1637_v60 = vld [vmem:[#allocation14 + $0x18] sm:$0xf0] }
  0xe9   :  { %v345_v10 = vpack.c.bf16 %v344_v9, %v344_v9  ;;  %v1989_v9 = vld [vmem:[#allocation14 + $0x14] sm:$0xf0] }
  0xea   :  { %1114 = vmatpush.bf16.msra.mxu2 %v1836_v59  ;;  %v1636_v13 = vor.u32 %v1989_v9, %v1635_v7  ;;  %v1669_v59 = vld [vmem:[#allocation14 + $0x58] sm:$0xf0]  ;;  %v1994_v7 = vld [vmem:[#allocation14 + $0x44] sm:$0xf]  ;;  %v1784_v9 = vor.u32 %v2024_v3, %v1781_v6  ;;  %v1629_v6 = vld [vmem:[#allocation14 + $0x8] sm:$0xf0] }
  0xeb   :  { %556 = vmatmul.bf16.vlgmr.msra.gmra.mxu3 %v345_v10  ;;  %569 = vmatmul.bf16.vlgmr.msra.gmra.mxu0 %v345_v10  ;;  %v1672_v63 = vor.u32 %v1996_v54, %v1669_v59  ;;  %v1988_v59 = vld [vmem:[#allocation14 + $0x14] sm:$0xf] }
  0xec   :  { %582 = vmatmul.bf16.vlgmr.msra.gmra.mxu1 %v345_v10  ;;  %595 = vmatmul.bf16.vlgmr.msrb.gmra.mxu2 %v345_v10  ;;  %v1827_v10 = vld [vmem:[#allocation14 + $0x190] sm:$0xf]  ;;  %v1640_v2 = vor.u32 %v1988_v59, %v1637_v60  ;;  %v2054_v60 = vld [vmem:[#allocation16 + $0x20] sm:$0xff] }
  0xed   :  { %1135 = vmatpush.bf16.msra.mxu0 %v1752_v4  ;;  %v1828_v14 = vor.u32 %v2037_v11, %v1827_v10  ;;  %1148 = vmatpush.bf16.msra.mxu1 %v1816_v8  ;;  %v1661_v10 = vld [vmem:[#allocation14 + $0x48] sm:$0xf0]  ;;  %v2042_v11 = vld [vmem:[#allocation14 + $0x1c4] sm:$0xf] }
  0xee   :  { %1076 = vmatpush.bf16.msrb.mxu3 %v1636_v13  ;;  %v2006_v13 = vld [vmem:[#allocation14 + $0xa4] sm:$0xf]  ;;  %v1664_v16 = vor.u32 %v1994_v7, %v1661_v10 }
  0xef   :  { %1115 = vmatpush.bf16.msra.mxu2 %v1828_v14  ;;  %v1709_v14 = vld [vmem:[#allocation14 + $0xa8] sm:$0xf0] }
  0xf1   :  { %1136 = vmatpush.bf16.msra.mxu0 %v1744_v18  ;;  %1149 = vmatpush.bf16.msra.mxu1 %v1808_v22  ;;  %v2022_v18 = vld [vmem:[#allocation14 + $0x124] sm:$0xf]  ;;  %v1712_v22 = vor.u32 %v2006_v13, %v1709_v14 }
  0xf2   :  { %1077 = vmatpush.bf16.msrb.mxu3 %v1628_v23  ;;  %v1776_v25 = vor.u32 %v2022_v18, %v1773_v19 }
  0xf3   :  { %1116 = vmatpush.bf16.msra.mxu2 %v1820_v27  ;;  %v1653_v27 = vld [vmem:[#allocation14 + $0x38] sm:$0xf0] }
  0xf4   :  { %v1656_v34 = vor.u32 %v1992_v26, %v1653_v27 }
  0xf5   :  { %1137 = vmatpush.bf16.msra.mxu0 %v1736_v39  ;;  %1150 = vmatpush.bf16.msra.mxu1 %v1800_v41  ;;  %v1645_v41 = vld [vmem:[#allocation14 + $0x28] sm:$0xf0] }
  0xf6   :  { %1122 = vmatpush.bf16.msra.mxu3 %v1688_v31  ;;  %v1845_v31 = vld [vmem:[#allocation14 + $0x1b8] sm:$0xf0] }
  0xf7   :  { %1161 = vmatpush.bf16.msrb.mxu2 %v1880_v32  ;;  %v2004_v32 = vld [vmem:[#allocation14 + $0x94] sm:$0xf]  ;;  %v1848_v35 = vor.u32 %v2040_v28, %v1845_v31 }
  0xf9   :  { %1138 = vmatpush.bf16.msra.mxu0 %v1728_v51  ;;  %1151 = vmatpush.bf16.msra.mxu1 %v1792_v58  ;;  %v1648_v51 = vor.u32 %v1990_v40, %v1645_v41 }
  0xfa   :  { %1123 = vmatpush.bf16.msra.mxu3 %v1680_v46  ;;  %v2038_v46 = vld [vmem:[#allocation14 + $0x1a4] sm:$0xf] }
  0xfb   :  { %1162 = vmatpush.bf16.msrb.mxu2 %v1872_v50  ;;  %v1840_v52 = vor.u32 %v2038_v46, %v1837_v47 }
  0xfd   :  { %1139 = vmatpush.bf16.msra.mxu0 %v1720_v5  ;;  %1152 = vmatpush.bf16.msra.mxu1 %v1784_v9  ;;  %v1986_v5 = vld [vmem:[#allocation14 + $0x4] sm:$0xf]  ;;  %v1821_v9 = vld [vmem:[#allocation14 + $0x188] sm:$0xf0] }
  0xfe   :  { %1124 = vmatpush.bf16.msra.mxu3 %v1672_v63  ;;  %v1829_v63 = vld [vmem:[#allocation14 + $0x198] sm:$0xf0]  ;;  %v1632_v13 = vor.u32 %v1986_v5, %v1629_v6 }
  0xff   :  { %1163 = vmatpush.bf16.msrb.mxu2 %v1864_v0 }
 0x101   :  { %1140 = vmatpush.bf16.msra.mxu0 %v1712_v22  ;;  %1153 = vmatpush.bf16.msra.mxu1 %v1776_v25 }
 0x102   :  { %1125 = vmatpush.bf16.msra.mxu3 %v1664_v16 }
 0x106   :  { %1126 = vmatpush.bf16.msra.mxu3 %v1656_v34 }
 0x10a   :  { %1127 = vmatpush.bf16.msra.mxu3 %v1648_v51 }
 0x10e   :  { %1128 = vmatpush.bf16.msra.mxu3 %v1640_v2 }
 0x112   :  { %1129 = vmatpush.bf16.msra.mxu3 %v1632_v13 }
 0x168   :  { %v570_v49 = vpop.f32.mrf.mxu0 }
 0x169   :  { %v571_v55 = vadd.f32 %v570_v49, %v381_v12  ;;  %v583_v57 = vpop.f32.mrf.mxu1  ;;  %v1853_v12 = vld [vmem:[#allocation14 + $0x1c8] sm:$0xf0] }
 0x16a   :  { %v584_v62 = vadd.f32 %v583_v57, %v382_v36  ;;  %v1856_v17 = vor.u32 %v2042_v11, %v1853_v12  ;;  %v1701_v36 = vld [vmem:[#allocation14 + $0x98] sm:$0xf0]  ;;  %v1693_v49 = vld [vmem:[#allocation14 + $0x88] sm:$0xf0] }
 0x16b   :  { %v1622_v4 = vmul.f32 -1.442695, %v571_v55  ;;  %v1704_v56 = vor.u32 %v2004_v32, %v1701_v36  ;;  %v1757_v55 = vld [vmem:[#allocation14 + $0x108] sm:$0xf0]  ;;  %v1696_v57 = vor.u32 %v2002_v48, %v1693_v49 }
 0x16c   :  { %v1623_v8 = vmul.f32 -1.442695, %v584_v62  ;;  %1164 = vmatpush.bf16.msrb.mxu2 %v1856_v17  ;;  %v1760_v58 = vor.u32 %v2018_v53, %v1757_v55  ;;  %v2036_v62 = vld [vmem:[#allocation14 + $0x194] sm:$0xf] }
 0x16d   :  { %2099 = vpow2.f32 %v1622_v4  ;;  %1141 = vmatpush.bf16.msra.mxu0 %v1704_v56  ;;  %v1832_v3 = vor.u32 %v2036_v62, %v1829_v63  ;;  %v2056_v55 = vld [vmem:[#allocation16 + $0x30] sm:$0xff]  ;;  %v2053_v62 = vld [vmem:[#allocation16 + $0x18] sm:$0xff] }
 0x16e   :  { %2101 = vpow2.f32 %v1623_v8  ;;  %v557_v15 = vpop.f32.mrf.mxu3  ;;  %v2034_v8 = vld [vmem:[#allocation14 + $0x184] sm:$0xf]  ;;  %v2065_v63 = vld [vmem:[#allocation16 + $0x78] sm:$0xff] }
 0x16f   :  { %v558_v20 = vadd.f32 %v557_v15, %v380_v37  ;;  %v596_v21 = vpop.f32.mrf.mxu2  ;;  %v2020_v37 = vld [vmem:[#allocation14 + $0x114] sm:$0xf]  ;;  %v1824_v17 = vor.u32 %v2034_v8, %v1821_v9  ;;  %v2051_v9 = vld [vmem:[#allocation16 + $0x8] sm:$0xff] }
 0x170   :  { %v597_v23 = vadd.f32 %v596_v21, %v383_v38  ;;  %v572_v24 = vpop.f32.mrf.mxu0  ;;  %v1765_v38 = vld [vmem:[#allocation14 + $0x118] sm:$0xf0]  ;;  %1165 = vmatpush.bf16.msrb.mxu2 %v1848_v35 }
 0x171   :  { %v1621_v29 = vmul.f32 -1.442695, %v558_v20  ;;  %v585_v30 = vpop.f32.mrf.mxu1  ;;  %v1768_v45 = vor.u32 %v2020_v37, %v1765_v38  ;;  %1142 = vmatpush.bf16.msra.mxu0 %v1696_v57  ;;  %v2055_v57 = vld [vmem:[#allocation16 + $0x28] sm:$0xff] }
 0x172   :  { %v1624_v33 = vmul.f32 -1.442695, %v597_v23 }
 0x173   :  { %v2100_v39 = vpop.eup %2099  ;;  %2103 = vpow2.f32 %v1621_v29  ;;  %1154 = vmatpush.bf16.msra.mxu1 %v1768_v45 }
 0x174   :  { %v2102_v43 = vpop.eup %2101  ;;  %v2636_v44 = vadd.f32 1.0, %v2100_v39  ;;  %2105 = vpow2.f32 %v1624_v33  ;;  %1166 = vmatpush.bf16.msrb.mxu2 %v1840_v52 }
 0x175   :  { %v2638_v42 = vadd.f32 1.0, %v2102_v43 }
 0x176   :  { %2107 = vrcp.f32 %v2636_v44  ;;  %v559_v50 = vpop.f32.mrf.mxu3  ;;  %v640_v15 = vand.u32 2147483647, %v2636_v44  ;;  %v642_v16 = vand.u32 2147483648, %v2636_v44  ;;  %vm636_vm14 = vweird.f32 %v2636_v44 }
 0x177   :  { %2109 = vrcp.f32 %v2638_v42  ;;  %v598_v54 = vpop.f32.mrf.mxu2  ;;  %1155 = vmatpush.bf16.msra.mxu1 %v1760_v58  ;;  %v655_v19 = vand.u32 2147483647, %v2638_v42  ;;  %v657_v20 = vand.u32 2147483648, %v2638_v42  ;;  %vm651_vm15 = vweird.f32 %v2638_v42 }
 0x178   :  { %1167 = vmatpush.bf16.msrb.mxu2 %v1832_v3  ;;  %vm641_vm1 = vcmp.eq.f32.partialorder %v640_v15, 8.507059e+37  ;;  %v643_v26 = vor.u32 1.1754944e-38, %v642_v16  ;;  %v2057_v54 = vld [vmem:[#allocation16 + $0x38] sm:$0xff]  ;;  %v2052_v3 = vld [vmem:[#allocation16 + $0x10] sm:$0xff]  ;;  %v2050_v15 = vld [vmem:[#allocation16] sm:$0xff] }
 0x179   :  { %v2104_v61 = vpop.eup %2103  ;;  %vm656_vm3 = vcmp.eq.f32.partialorder %v655_v19, 8.507059e+37  ;;  %v658_v30 = vor.u32 1.1754944e-38, %v657_v20  ;;  %v2062_v16 = vld [vmem:[#allocation16 + $0x60] sm:$0xff]  ;;  %v2061_v20 = vld [vmem:[#allocation16 + $0x58] sm:$0xff] }
 0x17a   :  { %v2106_v0 = vpop.eup %2105  ;;  %v2642_v1 = vadd.f32 1.0, %v2104_v61  ;;  %v744_v61 = vld [vmem:[%s2694_s10] sm:$0x3] }
 0x17b   :  { %v2644_v4 = vadd.f32 1.0, %v2106_v0  ;;  %v746_v2 = vperm.slane %v744_v61, 0 }
 0x17c   :  { %v2108_v7 = vpop.eup %2107  ;;  %2111 = vrcp.f32 %v2642_v1  ;;  %1168 = vmatpush.bf16.msrb.mxu2 %v1824_v17  ;;  %v625_v33 = vand.u32 2147483647, %v2642_v1  ;;  %v627_v34 = vand.u32 2147483648, %v2642_v1  ;;  %vm621_vm7 = vweird.f32 %v2642_v1 }
 0x17d   :  { %v2110_v10 = vpop.eup %2109  ;;  %2113 = vrcp.f32 %v2644_v4  ;;  %v632_v11 = vmul.f32 %v2108_v7, %v2636_v44  ;;  %vm637_vm13 = vweird.f32 %v2108_v7  ;;  %v672_v39 = vand.u32 2147483648, %v2644_v4 }
 0x17e   :  { %v647_v12 = vmul.f32 %v2110_v10, %v2638_v42  ;;  %vm652_vm0 = vweird.f32 %v2110_v10  ;;  %vm638_vm2 = vmor %vm636_vm14, %vm637_vm13  ;;  %v670_v44 = vand.u32 2147483647, %v2644_v4  ;;  %v628_v46 = vor.u32 1.1754944e-38, %v627_v34 }
 0x17f   :  { %v633_v14 = vsub.f32 1.0, %v632_v11  ;;  %vm653_vm4 = vmor %vm651_vm15, %vm652_vm0  ;;  %vm666_vm9 = vweird.f32 %v2644_v4  ;;  %vm626_vm10 = vcmp.eq.f32.partialorder %v625_v33, 8.507059e+37  ;;  %v673_v48 = vor.u32 1.1754944e-38, %v672_v39  ;;  %v2058_v33 = vld [vmem:[#allocation16 + $0x40] sm:$0xff] }
 0x180   :  { %v648_v18 = vsub.f32 1.0, %v647_v12  ;;  %vm671_vm12 = vcmp.eq.f32.partialorder %v670_v44, 8.507059e+37 }
 0x181   :  { %v634_v21 = vmul.f32 %v2108_v7, %v633_v14 }
 0x182   :  { %v2112_v22 = vpop.eup %2111  ;;  %v649_v23 = vmul.f32 %v2110_v10, %v648_v18 }
 0x183   :  { %v2114_v24 = vpop.eup %2113  ;;  %v635_v25 = vadd.f32 %v2108_v7, %v634_v21  ;;  %v617_v27 = vmul.f32 %v2112_v22, %v2642_v1  ;;  %vm622_vm5 = vweird.f32 %v2112_v22 }
 0x184   :  { %v662_v28 = vmul.f32 %v2114_v24, %v2644_v4  ;;  %v650_v29 = vadd.f32 %v2110_v10, %v649_v23  ;;  %vm667_vm6 = vweird.f32 %v2114_v24  ;;  %vm623_vm8 = vmor %vm621_vm7, %vm622_vm5  ;;  %v2064_v4 = vld [vmem:[#allocation16 + $0x70] sm:$0xff]  ;;  %v747_v23 = vperm.slane %v744_v61, 1 }
 0x185   :  { %v639_v31 = vsel %vm638_vm2, %v2108_v7, %v635_v25  ;;  %v618_v32 = vsub.f32 1.0, %v617_v27  ;;  %vm668_vm11 = vmor %vm666_vm9, %vm667_vm6 }
 0x186   :  { %v663_v35 = vsub.f32 1.0, %v662_v28  ;;  %v644_v36 = vsel %vm641_vm1, %v643_v26, %v639_v31  ;;  %v654_v37 = vsel %vm653_vm4, %v2110_v10, %v650_v29  ;;  %v2063_v10 = vld [vmem:[#allocation16 + $0x68] sm:$0xff] }
 0x187   :  { %v677_v56 = vpack.c.bf16 %v644_v36, %v644_v36  ;;  %v659_v38 = vsel %vm656_vm3, %v658_v30, %v654_v37  ;;  %v619_v40 = vmul.f32 %v2112_v22, %v618_v32  ;;  %v2059_v29 = vld [vmem:[#allocation16 + $0x48] sm:$0xff] }
 0x188   :  { %v678_v41 = vpack.c.bf16 %v659_v38, %v659_v38  ;;  %v664_v43 = vmul.f32 %v2114_v24, %v663_v35 }
 0x189   :  { %1091 = vmatmul.bf16.vlgmr.msrb.gmra.mxu0 %v677_v56  ;;  %v620_v45 = vadd.f32 %v2112_v22, %v619_v40 }
 0x18a   :  { %1104 = vmatmul.bf16.vlgmr.msrb.gmra.mxu1 %v678_v41  ;;  %v665_v47 = vadd.f32 %v2114_v24, %v664_v43  ;;  %1359 = vmatpush.bf16.msrb.mxu0 %v2065_v63  ;;  %v2086_v63 = vld [vmem:[%s2696_s12] ss:$0 sm:$0xff] }
 0x18b   :  { %v624_v42 = vsel %vm623_vm8, %v2112_v22, %v620_v45 }
 0x18c   :  { %v629_v49 = vsel %vm626_vm10, %v628_v46, %v624_v42  ;;  %v669_v50 = vsel %vm668_vm11, %v2114_v24, %v665_v47  ;;  %v2060_v24 = vld [vmem:[#allocation16 + $0x50] sm:$0xff] }
 0x18d   :  { %v676_v51 = vpack.c.bf16 %v629_v49, %v629_v49  ;;  %v674_v52 = vsel %vm671_vm12, %v673_v48, %v669_v50 }
 0x18e   :  { %v679_v53 = vpack.c.bf16 %v674_v52, %v674_v52  ;;  %1360 = vmatpush.bf16.msrb.mxu0 %v2064_v4 }
 0x18f   :  { %1078 = vmatmul.bf16.vlgmr.msrb.gmra.mxu3 %v676_v51 }
 0x190   :  { %1117 = vmatmul.bf16.vlgmr.msra.gmra.mxu2 %v679_v53  ;;  %1346 = vmatpush.bf16.msrb.mxu3 %v2057_v54 }
 0x192   :  { %1361 = vmatpush.bf16.msrb.mxu0 %v2063_v10 }
 0x194   :  { %1347 = vmatpush.bf16.msrb.mxu3 %v2056_v55 }
 0x196   :  { %1362 = vmatpush.bf16.msrb.mxu0 %v2062_v16 }
 0x198   :  { %1348 = vmatpush.bf16.msrb.mxu3 %v2055_v57 }
 0x199   :  { %1143 = vmatmul.bf16.vlgmr.msra.gmra.mxu0 %v677_v56 }
 0x19a   :  { %1156 = vmatmul.bf16.vlgmr.msra.gmra.mxu1 %v678_v41  ;;  %1363 = vmatpush.bf16.msrb.mxu0 %v2061_v20 }
 0x19c   :  { %1349 = vmatpush.bf16.msrb.mxu3 %v2054_v60 }
 0x19e   :  { %1364 = vmatpush.bf16.msrb.mxu0 %v2060_v24 }
 0x19f   :  { %1130 = vmatmul.bf16.vlgmr.msra.gmra.mxu3 %v676_v51 }
 0x1a0   :  { %1169 = vmatmul.bf16.vlgmr.msrb.gmra.mxu2 %v679_v53  ;;  %1350 = vmatpush.bf16.msrb.mxu3 %v2053_v62 }
 0x1a2   :  { %1365 = vmatpush.bf16.msrb.mxu0 %v2059_v29 }
 0x1a4   :  { %1351 = vmatpush.bf16.msrb.mxu3 %v2052_v3 }
 0x1a6   :  { %1366 = vmatpush.bf16.msrb.mxu0 %v2058_v33 }
 0x1a8   :  { %1352 = vmatpush.bf16.msrb.mxu3 %v2051_v9 }
 0x1ac   :  { %1353 = vmatpush.bf16.msrb.mxu3 %v2050_v15 }
 0x206   :  { %v1092_v58 = vpop.f32.mrf.mxu0 }
 0x207   :  { %v1105_v59 = vpop.f32.mrf.mxu1 }
 0x20e   :  { %v1094_v0 = vpop.f32.mrf.mxu0 }
 0x20f   :  { %v1107_v1 = vpop.f32.mrf.mxu1 }
 0x212   :  { %v1079_v5 = vpop.f32.mrf.mxu3 }
 0x213   :  { %v1080_v6 = vadd.f32 %v1079_v5, %v746_v2  ;;  %v1118_v7 = vpop.f32.mrf.mxu2 }
 0x215   :  { %v1093_v8 = vadd.f32 %v1092_v58, %v1080_v6 }
 0x216   :  { %v1144_v11 = vpop.f32.mrf.mxu0 }
 0x217   :  { %v1106_v12 = vadd.f32 %v1105_v59, %v1093_v8  ;;  %v1157_v13 = vpop.f32.mrf.mxu1 }
 0x219   :  { %v1119_v14 = vadd.f32 %v1118_v7, %v1106_v12 }
 0x21a   :  { %v1081_v17 = vpop.f32.mrf.mxu3 }
 0x21b   :  { %v1881_v18 = vmul.f32 -1.442695, %v1119_v14  ;;  %v1120_v19 = vpop.f32.mrf.mxu2 }
 0x21d   :  { %2115 = vpow2.f32 %v1881_v18 }
 0x21e   :  { %v1146_v21 = vpop.f32.mrf.mxu0 }
 0x21f   :  { %v1159_v22 = vpop.f32.mrf.mxu1 }
 0x222   :  { %v1131_v25 = vpop.f32.mrf.mxu3 }
 0x223   :  { %v2116_v26 = vpop.eup %2115  ;;  %v1132_v27 = vadd.f32 %v1131_v25, %v747_v23  ;;  %v1170_v28 = vpop.f32.mrf.mxu2 }
 0x224   :  { %v1180_v30 = vadd.f32 1.0, %v2116_v26 }
 0x225   :  { %v1145_v31 = vadd.f32 %v1144_v11, %v1132_v27 }
 0x226   :  { %2117 = vrcp.f32 %v1180_v30  ;;  %v1193_v40 = vand.u32 2147483648, %v1180_v30  ;;  %v1191_v43 = vand.u32 2147483647, %v1180_v30  ;;  %vm1187_vm14 = vweird.f32 %v1180_v30 }
 0x227   :  { %v1158_v32 = vadd.f32 %v1157_v13, %v1145_v31 }
 0x228   :  { %v1194_v47 = vor.u32 1.1754944e-38, %v1193_v40  ;;  %vm1192_vm0 = vcmp.eq.f32.partialorder %v1191_v43, 8.507059e+37 }
 0x229   :  { %v1171_v34 = vadd.f32 %v1170_v28, %v1158_v32 }
 0x22a   :  { %v1133_v35 = vpop.f32.mrf.mxu3 }
 0x22b   :  { %v1882_v36 = vmul.f32 -1.442695, %v1171_v34  ;;  %v1172_v37 = vpop.f32.mrf.mxu2 }
 0x22c   :  { %v2118_v39 = vpop.eup %2117 }
 0x22d   :  { %v1183_v56 = vmul.f32 %v2118_v39, %v1180_v30  ;;  %2119 = vpow2.f32 %v1882_v36  ;;  %vm1188_vm13 = vweird.f32 %v2118_v39 }
 0x22e   :  { %vm1189_vm15 = vmor %vm1187_vm14, %vm1188_vm13 }
 0x22f   :  { %v1184_v38 = vsub.f32 1.0, %v1183_v56 }
 0x231   :  { %v1185_v41 = vmul.f32 %v2118_v39, %v1184_v38 }
 0x233   :  { %v2120_v44 = vpop.eup %2119  ;;  %v1186_v45 = vadd.f32 %v2118_v39, %v1185_v41 }
 0x234   :  { %v1181_v46 = vadd.f32 1.0, %v2120_v44 }
 0x235   :  { %v1190_v42 = vsel %vm1189_vm15, %v2118_v39, %v1186_v45 }
 0x236   :  { %2121 = vrcp.f32 %v1181_v46  ;;  %v1195_v48 = vsel %vm1192_vm0, %v1194_v47, %v1190_v42  ;;  %v1208_v53 = vand.u32 2147483648, %v1181_v46  ;;  %v1206_v55 = vand.u32 2147483647, %v1181_v46 }
 0x237   :  { %v1212_v49 = vpack.c.bf16 %v1195_v48, %v1195_v48  ;;  %vm1202_vm2 = vweird.f32 %v1181_v46 }
 0x238   :  { %v1209_v58 = vor.u32 1.1754944e-38, %v1208_v53  ;;  %vm1207_vm4 = vcmp.eq.f32.partialorder %v1206_v55, 8.507059e+37 }
 0x239   :  { %1354 = vmatmul.bf16.vlgmr.msrb.gmra.mxu3 %v1212_v49 }
 0x23c   :  { %v2122_v50 = vpop.eup %2121 }
 0x23d   :  { %v1198_v51 = vmul.f32 %v2122_v50, %v1181_v46  ;;  %vm1203_vm1 = vweird.f32 %v2122_v50 }
 0x23e   :  { %vm1204_vm3 = vmor %vm1202_vm2, %vm1203_vm1 }
 0x23f   :  { %v1199_v52 = vsub.f32 1.0, %v1198_v51 }
 0x241   :  { %v1200_v54 = vmul.f32 %v2122_v50, %v1199_v52 }
 0x243   :  { %v1201_v57 = vadd.f32 %v2122_v50, %v1200_v54 }
 0x245   :  { %v1205_v59 = vsel %vm1204_vm3, %v2122_v50, %v1201_v57 }
 0x246   :  { %v1210_v60 = vsel %vm1207_vm4, %v1209_v58, %v1205_v59 }
 0x247   :  { %v1213_v61 = vpack.c.bf16 %v1210_v60, %v1210_v60 }
 0x249   :  { %1367 = vmatmul.bf16.vlgmr.msrb.gmra.mxu0 %v1213_v61 }
 0x2bc   :  { %v1355_v62 = vpop.f32.mrf.mxu3 }
 0x2bd   :  { %v1356_v1 = vadd.f32 %v2086_v63, %v1355_v62 }
 0x2c4   :  { %v1357_v0 = vpop.f32.mrf.mxu3 }
 0x2c6   :  { %v1368_v2 = vpop.f32.mrf.mxu0 }
 0x2c7   :  { %v1369_v3 = vadd.f32 %v1368_v2, %v1356_v1 }
 0x2c9   :  { %v1947_v4 = vmul.f32 -1.442695, %v1369_v3 }
 0x2cb   :  { %2123 = vpow2.f32 %v1947_v4 }
 0x2ce   :  { %v1370_v5 = vpop.f32.mrf.mxu0 }
 0x2d1   :  { %v2124_v6 = vpop.eup %2123 }
 0x2d2   :  { %v1375_v7 = vadd.f32 1.0, %v2124_v6 }
 0x2d4   :  { %2125 = vrcp.f32 %v1375_v7  ;;  %v1387_v11 = vand.u32 2147483648, %v1375_v7  ;;  %v1385_v13 = vand.u32 2147483647, %v1375_v7  ;;  %vm1381_vm6 = vweird.f32 %v1375_v7 }
 0x2d6   :  { %v1388_v15 = vor.u32 1.1754944e-38, %v1387_v11  ;;  %vm1386_vm8 = vcmp.eq.f32.partialorder %v1385_v13, 8.507059e+37 }
 0x2da   :  { %v2126_v8 = vpop.eup %2125 }
 0x2db   :  { %v1377_v9 = vmul.f32 %v2126_v8, %v1375_v7  ;;  %vm1382_vm5 = vweird.f32 %v2126_v8 }
 0x2dc   :  { %vm1383_vm7 = vmor %vm1381_vm6, %vm1382_vm5 }
 0x2dd   :  { %v1378_v10 = vsub.f32 1.0, %v1377_v9 }
 0x2df   :  { %v1379_v12 = vmul.f32 %v2126_v8, %v1378_v10 }
 0x2e1   :  { %v1380_v14 = vadd.f32 %v2126_v8, %v1379_v12 }
 0x2e3   :  { %v1384_v16 = vsel %vm1383_vm7, %v2126_v8, %v1380_v14 }
 0x2e4   :  { %v1389_v17 = vsel %vm1386_vm8, %v1388_v15, %v1384_v16 }
 0x2e5   :  { %1391 = vst [vmem:[#allocation17] sm:$0xff] %v1389_v17 }
 0x2e6   :  { %1405 = dma.vmem_to_hbm [thread:$0]  %s1401_s16, 128, %s1403_s18, [#allocation4]  }
 0x2e7   :  { %2449 = dma.done.wait [#allocation4], 128  }
 0x2e8   :  { %2450 = vsyncadd [#allocation4], 4294967168 }
 0x2e9   :  { %2451 = dma.done.wait [#allocation19], 256  }
 0x2ea   :  { %2452 = vsyncadd [#allocation19], 4294967040 }
 0x2eb   :  { %2453 = dma.done.wait [#allocation22], 128  }
 0x2ec   :  { %2454 = vsyncadd [#allocation22], 4294967168 }
 0x2ed   :  { %1455 = vsyncpa [#allocation3], 1 }
 0x2ee   :  { %1456 = vsyncpa [#allocation6], 1 }
 0x2ef   :  { %1457 = vsyncpa [#allocation9], 1 }
 0x2f0   :  { %1458 = vsyncpa [#allocation12], 1 }
 0x2f1   :  { %1459 = vsyncpa [#allocation15], 1 }
 0x2f2   :  { %1460 = vsyncpa [#allocation4], 1 }
 0x2f3   :  { %1461 = vsyncpa [#allocation19], 1 }
 0x2f4   :  { %1462 = vsyncpa [#allocation22], 1 }

</bundles_post_ra>
